<compile_context>
chip_gen: v7x
topology: tpu7x:2x2x1
jax: 0.10.0
libtpu: 0.0.40
codegen_flags: <defaults>
</compile_context>

<pallas_src>
import functools
import math

import jax
import jax.numpy as jnp
from jax.experimental import pallas as pl
from jax.experimental.pallas import tpu as pltpu


# --------------------------------------------------------------------------
# Fused LSTM kernel: per-chunk input projection + serial recurrence
# --------------------------------------------------------------------------
def fused_lstm_kernel(x_ref, w_x_ref, w_h_ref, b_ref,
                      out_ref, hN_ref, cN_ref, gx_ref,
                      *, hidden, t_chunk, batch):
    H = hidden
    ci = pl.program_id(0)

    # Zero-init the resident carry blocks on the first chunk only.
    @pl.when(ci == 0)
    def _init():
        hN_ref[...] = jnp.zeros_like(hN_ref)
        cN_ref[...] = jnp.zeros_like(cN_ref)

    # ---- per-chunk input projection (independent of h -> off the serial
    #      h-dependency chain); result lives only in VMEM scratch. ----------
    w_x = w_x_ref[...]                       # (K, 4H) resident across chunks
    bias = b_ref[...]                        # (1, 4H)
    # Small static loop over batch keeps every dot a plain 2D MXU matmul
    # (no in-kernel reshape needed).  For large B this would be collapsed
    # into a single (B*tc, K) GEMM instead.
    for b in range(batch):
        gx_ref[b] = (
            jnp.dot(x_ref[b], w_x, preferred_element_type=jnp.float32) + bias
        )

    # ---- serial recurrence over the chunk's timesteps --------------------
    h = hN_ref[...]                          # (B, H) carry in resident block
    c = cN_ref[...]                          # (B, H)
    w_h = w_h_ref[...]                       # (H, 4H)

    for s in range(t_chunk):
        # Only one (B,H)@(H,4H) MXU call + elementwise work per serial step.
        gates = gx_ref[:, s, :] + jnp.dot(h, w_h,
                                          preferred_element_type=jnp.float32)
        # Gate columns were permuted offline to (i, f, o, g):
        #   sigmoid over the first 3H columns, tanh only over the last H.
        ifo = jax.nn.sigmoid(gates[:, :3 * H])
        g = jnp.tanh(gates[:, 3 * H:])
        i = ifo[:, 0 * H:1 * H]
        f = ifo[:, 1 * H:2 * H]
        o = ifo[:, 2 * H:3 * H]
        c = f * c + i * g
        h = o * jnp.tanh(c)
        out_ref[:, s, :] = h                 # VMEM store; one HBM DMA / chunk

    # Unconditional carry writeback (blocks are resident across the grid).
    hN_ref[...] = h
    cN_ref[...] = c


# --------------------------------------------------------------------------
# Helpers
# --------------------------------------------------------------------------
def _vmem_budget_bytes(default=4 * 1024 * 1024):
    """Conservative VMEM budget for the chunk working set."""
    try:
        info = pltpu.get_tpu_info()
        return min(8 * 1024 * 1024, int(info.vmem_capacity_bytes) // 8)
    except Exception:
        return default


def _pick_time_chunk(T, B, H, K, max_chunk=32, vmem_budget=None):
    """Chunk length: multiple of 8 dividing T, sized to fit the VMEM budget."""
    if vmem_budget is None:
        vmem_budget = _vmem_budget_bytes()
    # Approximate f32 VMEM bytes per chunk-timestep:
    #   x block (double-buffered) + gates scratch + out block (double-buffered)
    per_step = 4 * B * (2 * K + 4 * H + 2 * H)
    cap = max(8, vmem_budget // max(per_step, 1))
    limit = max(8, min(max_chunk, cap))
    if T <= limit:
        return T
    for c in range(limit, 7, -1):
        if c % 8 == 0 and T % c == 0:
            return c
    # TODO(synk): for awkward T (no multiple-of-8 divisor <= limit) pad T to a
    # multiple of 8 and mask the tail instead of fully unrolling T steps.
    return T


# --------------------------------------------------------------------------
# Host-side wrapper
# --------------------------------------------------------------------------
def encoder_forward(imu, rss, params, *, max_chunk=32):
    """imu: (B,T,num_imu), rss: (B,T,num_ap) -> (out (B,T,H), [h (B,H), c (B,H)])."""
    B, T, num_imu = imu.shape
    num_ap = rss.shape[-1]
    H = params["w_rss"].shape[0]
    K = num_imu + num_ap

    imu = imu.astype(jnp.float32)
    rss = rss.astype(jnp.float32)
    x = jnp.concatenate([imu, rss], axis=-1)             # (B, T, K)

    # ---- offline weight fusion (rss Linear folded into gate input weights) --
    w_ih = params["w_ih"].astype(jnp.float32)             # (4H, num_imu + H)
    w_gi = w_ih[:, :num_imu].T                            # (num_imu, 4H)
    w_gr = w_ih[:, num_imu:].T                            # (H, 4H)
    w_xr = params["w_rss"].astype(jnp.float32).T @ w_gr   # (num_ap, 4H)
    w_x = jnp.concatenate([w_gi, w_xr], axis=0)           # (K, 4H) stacked on K
    b_fused = (params["b_rss"].astype(jnp.float32) @ w_gr
               + params["b_ih"].astype(jnp.float32)
               + params["b_hh"].astype(jnp.float32))      # (4H,)
    w_h = params["w_hh"].astype(jnp.float32).T            # (H, 4H)

    # Permute gate columns (i, f, g, o) -> (i, f, o, g) so the kernel can run
    # a contiguous sigmoid over 3H and a tanh over the trailing H.
    def reorder(m):
        return jnp.concatenate(
            [m[..., :2 * H], m[..., 3 * H:4 * H], m[..., 2 * H:3 * H]], axis=-1)

    w_x = reorder(w_x)
    w_h = reorder(w_h)
    b_f = reorder(b_fused)[None, :]                       # (1, 4H)

    tc = _pick_time_chunk(T, B, H, K, max_chunk=max_chunk)
    kernel = functools.partial(fused_lstm_kernel, hidden=H, t_chunk=tc, batch=B)

    out, hN, cN = pl.pallas_call(
        kernel,
        grid=(T // tc,),
        in_specs=[
            pl.BlockSpec((B, tc, K), lambda ci: (0, ci, 0)),   # x time chunk
            pl.BlockSpec((K, 4 * H), lambda ci: (0, 0)),       # fused W_x
            pl.BlockSpec((H, 4 * H), lambda ci: (0, 0)),       # W_h
            pl.BlockSpec((1, 4 * H), lambda ci: (0, 0)),       # fused bias
        ],
        out_specs=[
            pl.BlockSpec((B, tc, H), lambda ci: (0, ci, 0)),   # sequence out
            pl.BlockSpec((B, H), lambda ci: (0, 0)),           # resident h
            pl.BlockSpec((B, H), lambda ci: (0, 0)),           # resident c
        ],
        out_shape=[
            jax.ShapeDtypeStruct((B, T, H), jnp.float32),
            jax.ShapeDtypeStruct((B, H), jnp.float32),
            jax.ShapeDtypeStruct((B, H), jnp.float32),
        ],
        scratch_shapes=[pltpu.VMEM((B, tc, 4 * H), jnp.float32)],  # gates_x
        compiler_params=pltpu.CompilerParams(
            dimension_semantics=("arbitrary",)),           # serial recurrence
    )(x, w_x, w_h, b_f)

    return out, [hN, cN]


# --------------------------------------------------------------------------
# Pure-JAX reference mirroring the PyTorch module (unfused, gate order i,f,g,o)
# --------------------------------------------------------------------------
def encoder_reference(imu, rss, params):
    H = params["w_rss"].shape[0]
    B = imu.shape[0]
    rss_enc = rss @ params["w_rss"].T + params["b_rss"]
    x = jnp.concatenate([imu, rss_enc], axis=-1)

    def step(carry, x_t):
        h, c = carry
        gates = (x_t @ params["w_ih"].T + params["b_ih"]
                 + h @ params["w_hh"].T + params["b_hh"])
        i, f, g, o = jnp.split(gates, 4, axis=-1)
        i = jax.nn.sigmoid(i)
        f = jax.nn.sigmoid(f)
        g = jnp.tanh(g)
        o = jax.nn.sigmoid(o)
        c = f * c + i * g
        h = o * jnp.tanh(c)
        return (h, c), h

    init = (jnp.zeros((B, H), jnp.float32), jnp.zeros((B, H), jnp.float32))
    (hN, cN), hs = jax.lax.scan(step, init, jnp.transpose(x, (1, 0, 2)))
    return jnp.transpose(hs, (1, 0, 2)), [hN, cN]


if __name__ == "__main__":
    # Small shapes consistent with the module's forward.
    B, T, num_imu, num_ap, H = 2, 8, 6, 10, 32

    key = jax.random.PRNGKey(0)
    keys = jax.random.split(key, 8)

    imu = jax.random.normal(keys[0], (B, T, num_imu), jnp.float32)
    rss = jax.random.normal(keys[1], (B, T, num_ap), jnp.float32)

    def uni(k, shape, bound):
        return jax.random.uniform(k, shape, jnp.float32, -bound, bound)

    lin_b = 1.0 / math.sqrt(num_ap)   # nn.Linear default init bound
    lstm_b = 1.0 / math.sqrt(H)       # nn.LSTM default init bound
    params = {
        "w_rss": uni(keys[2], (H, num_ap), lin_b),
        "b_rss": uni(keys[3], (H,), lin_b),
        "w_ih": uni(keys[4], (4 * H, num_imu + H), lstm_b),
        "w_hh": uni(keys[5], (4 * H, H), lstm_b),
        "b_ih": uni(keys[6], (4 * H,), lstm_b),
        "b_hh": uni(keys[7], (4 * H,), lstm_b),
    }

    out, (hN, cN) = encoder_forward(imu, rss, params)
    jax.block_until_ready((out, hN, cN))

    ref_out, (ref_h, ref_c) = encoder_reference(imu, rss, params)
    assert out.shape == (B, T, H) and hN.shape == (B, H) and cN.shape == (B, H)
    # Tolerance relaxed vs 1e-5: folding the rss Linear into the gate weights
    # changes float summation order.
    assert jnp.allclose(out, ref_out, atol=1e-4, rtol=1e-4)
    assert jnp.allclose(hN, ref_h, atol=1e-4, rtol=1e-4)
    assert jnp.allclose(cN, ref_c, atol=1e-4, rtol=1e-4)

    print("KERNEL_OK")
</pallas_src>

<mosaic_0001>
module attributes {stable_mosaic.version = 11 : i64} {
  func.func @fused_lstm_kernel(%arg0: i32, %arg1: memref<2x8x16xf32, #tpu.memory_space<vmem>>, %arg2: memref<16x128xf32, #tpu.memory_space<vmem>>, %arg3: memref<32x128xf32, #tpu.memory_space<vmem>>, %arg4: memref<1x128xf32, #tpu.memory_space<vmem>>, %arg5: memref<2x8x32xf32, #tpu.memory_space<vmem>>, %arg6: memref<2x32xf32, #tpu.memory_space<vmem>>, %arg7: memref<2x32xf32, #tpu.memory_space<vmem>>, %arg8: memref<2x8x128xf32, #tpu.memory_space<vmem>>) attributes {dimension_semantics = [#tpu.dimension_semantics<arbitrary>], iteration_bounds = array<i64: 1>, scalar_prefetch = 0 : i64, scratch_operands = 1 : i64, tpu.core_type = #tpu.core_type<tc>, window_params = [{transform_indices = @transform_0, window_bounds = array<i64: 2, 8, 16>}, {pipeline_mode = #tpu.pipeline_mode<synchronous>, transform_indices = @transform_1, window_bounds = array<i64: 16, 128>}, {pipeline_mode = #tpu.pipeline_mode<synchronous>, transform_indices = @transform_2, window_bounds = array<i64: 32, 128>}, {pipeline_mode = #tpu.pipeline_mode<synchronous>, transform_indices = @transform_3, window_bounds = array<i64: 1, 128>}, {transform_indices = @transform_4, window_bounds = array<i64: 2, 8, 32>}, {pipeline_mode = #tpu.pipeline_mode<synchronous>, transform_indices = @transform_5, window_bounds = array<i64: 2, 32>}, {pipeline_mode = #tpu.pipeline_mode<synchronous>, transform_indices = @transform_6, window_bounds = array<i64: 2, 32>}]} {
    %c0_i32 = arith.constant 0 : i32
    %0 = arith.cmpi eq, %arg0, %c0_i32 : i32
    %1 = arith.extui %0 : i1 to i32
    %c0_i32_0 = arith.constant 0 : i32
    %2 = arith.cmpi ne, %1, %c0_i32_0 : i32
    scf.if %2 {
      %cst_84 = arith.constant 0.000000e+00 : f32
      %210 = vector.broadcast %cst_84 : f32 to vector<2x32xf32>
      %c0_85 = arith.constant 0 : index
      %c0_86 = arith.constant 0 : index
      %211 = vector.load %arg6[%c0_85, %c0_86] : memref<2x32xf32, #tpu.memory_space<vmem>>, vector<2x32xf32>
      tpu.vector_store %arg6[%c0_85, %c0_86], %210 {strides = array<i32>} : memref<2x32xf32, #tpu.memory_space<vmem>>, vector<2x32xf32>,
      %cst_87 = arith.constant 0.000000e+00 : f32
      %212 = vector.broadcast %cst_87 : f32 to vector<2x32xf32>
      %c0_88 = arith.constant 0 : index
      %c0_89 = arith.constant 0 : index
      %213 = vector.load %arg7[%c0_88, %c0_89] : memref<2x32xf32, #tpu.memory_space<vmem>>, vector<2x32xf32>
      tpu.vector_store %arg7[%c0_88, %c0_89], %212 {strides = array<i32>} : memref<2x32xf32, #tpu.memory_space<vmem>>, vector<2x32xf32>,
    } else {
    }
    %c0 = arith.constant 0 : index
    %c0_1 = arith.constant 0 : index
    %3 = vector.load %arg2[%c0, %c0_1] : memref<16x128xf32, #tpu.memory_space<vmem>>, vector<16x128xf32>
    %c0_2 = arith.constant 0 : index
    %c0_3 = arith.constant 0 : index
    %4 = vector.load %arg4[%c0_2, %c0_3] : memref<1x128xf32, #tpu.memory_space<vmem>>, vector<1x128xf32>
    %c0_4 = arith.constant 0 : index
    %c0_5 = arith.constant 0 : index
    %c0_6 = arith.constant 0 : index
    %5 = vector.load %arg1[%c0_4, %c0_5, %c0_6] : memref<2x8x16xf32, #tpu.memory_space<vmem>>, vector<1x8x16xf32>
    %6 = vector.shape_cast %5 : vector<1x8x16xf32> to vector<8x16xf32>
    %cst = arith.constant dense<0.000000e+00> : vector<8x128xf32>
    %7 = tpu.matmul %6, %3, %cst {dimension_numbers = #tpu.dot_dimension_numbers<[1], [0], [0], [1], [0, 0, 1, 1], [], []>} : vector<8x16xf32>, vector<16x128xf32>, vector<8x128xf32> -> vector<8x128xf32>
    %8 = vector.broadcast %4 : vector<1x128xf32> to vector<8x128xf32>
    %9 = arith.addf %7, %8 : vector<8x128xf32>
    %c0_7 = arith.constant 0 : index
    %c0_8 = arith.constant 0 : index
    %c0_9 = arith.constant 0 : index
    %10 = vector.load %arg8[%c0_7, %c0_8, %c0_9] : memref<2x8x128xf32, #tpu.memory_space<vmem>>, vector<1x8x128xf32>
    %11 = vector.shape_cast %10 : vector<1x8x128xf32> to vector<8x128xf32>
    %12 = vector.shape_cast %9 : vector<8x128xf32> to vector<1x8x128xf32>
    tpu.vector_store %arg8[%c0_7, %c0_8, %c0_9], %12 {strides = array<i32>} : memref<2x8x128xf32, #tpu.memory_space<vmem>>, vector<1x8x128xf32>,
    %c1 = arith.constant 1 : index
    %c0_10 = arith.constant 0 : index
    %c0_11 = arith.constant 0 : index
    %13 = vector.load %arg1[%c1, %c0_10, %c0_11] : memref<2x8x16xf32, #tpu.memory_space<vmem>>, vector<1x8x16xf32>
    %14 = vector.shape_cast %13 : vector<1x8x16xf32> to vector<8x16xf32>
    %cst_12 = arith.constant dense<0.000000e+00> : vector<8x128xf32>
    %15 = tpu.matmul %14, %3, %cst_12 {dimension_numbers = #tpu.dot_dimension_numbers<[1], [0], [0], [1], [0, 0, 1, 1], [], []>} : vector<8x16xf32>, vector<16x128xf32>, vector<8x128xf32> -> vector<8x128xf32>
    %16 = vector.broadcast %4 : vector<1x128xf32> to vector<8x128xf32>
    %17 = arith.addf %15, %16 : vector<8x128xf32>
    %c1_13 = arith.constant 1 : index
    %c0_14 = arith.constant 0 : index
    %c0_15 = arith.constant 0 : index
    %18 = vector.load %arg8[%c1_13, %c0_14, %c0_15] : memref<2x8x128xf32, #tpu.memory_space<vmem>>, vector<1x8x128xf32>
    %19 = vector.shape_cast %18 : vector<1x8x128xf32> to vector<8x128xf32>
    %20 = vector.shape_cast %17 : vector<8x128xf32> to vector<1x8x128xf32>
    tpu.vector_store %arg8[%c1_13, %c0_14, %c0_15], %20 {strides = array<i32>} : memref<2x8x128xf32, #tpu.memory_space<vmem>>, vector<1x8x128xf32>,
    %c0_16 = arith.constant 0 : index
    %c0_17 = arith.constant 0 : index
    %21 = vector.load %arg6[%c0_16, %c0_17] : memref<2x32xf32, #tpu.memory_space<vmem>>, vector<2x32xf32>
    %c0_18 = arith.constant 0 : index
    %c0_19 = arith.constant 0 : index
    %22 = vector.load %arg7[%c0_18, %c0_19] : memref<2x32xf32, #tpu.memory_space<vmem>>, vector<2x32xf32>
    %c0_20 = arith.constant 0 : index
    %c0_21 = arith.constant 0 : index
    %23 = vector.load %arg3[%c0_20, %c0_21] : memref<32x128xf32, #tpu.memory_space<vmem>>, vector<32x128xf32>
    %c0_22 = arith.constant 0 : index
    %c0_23 = arith.constant 0 : index
    %c0_24 = arith.constant 0 : index
    %24 = vector.load %arg8[%c0_22, %c0_23, %c0_24] : memref<2x8x128xf32, #tpu.memory_space<vmem>>, vector<2x1x128xf32>
    %25 = vector.shape_cast %24 : vector<2x1x128xf32> to vector<2x128xf32>
    %cst_25 = arith.constant dense<0.000000e+00> : vector<2x128xf32>
    %26 = tpu.matmul %21, %23, %cst_25 {dimension_numbers = #tpu.dot_dimension_numbers<[1], [0], [0], [1], [0, 0, 1, 1], [], []>} : vector<2x32xf32>, vector<32x128xf32>, vector<2x128xf32> -> vector<2x128xf32>
    %27 = arith.addf %25, %26 : vector<2x128xf32>
    %28 = vector.extract_strided_slice %27 {offsets = [0, 0], sizes = [2, 96], strides = [1, 1]} : vector<2x128xf32> to vector<2x96xf32>
    %29 = arith.negf %28 : vector<2x96xf32>
    %30 = math.exp %29 : vector<2x96xf32>
    %cst_26 = arith.constant 1.000000e+00 : f32
    %31 = vector.broadcast %cst_26 : f32 to vector<2x96xf32>
    %32 = arith.addf %31, %30 : vector<2x96xf32>
    %33 = arith.divf %31, %32 : vector<2x96xf32>
    %34 = vector.extract_strided_slice %27 {offsets = [0, 96], sizes = [2, 32], strides = [1, 1]} : vector<2x128xf32> to vector<2x32xf32>
    %35 = math.tanh %34 : vector<2x32xf32>
    %36 = vector.extract_strided_slice %33 {offsets = [0, 0], sizes = [2, 32], strides = [1, 1]} : vector<2x96xf32> to vector<2x32xf32>
    %37 = vector.extract_strided_slice %33 {offsets = [0, 32], sizes = [2, 32], strides = [1, 1]} : vector<2x96xf32> to vector<2x32xf32>
    %38 = vector.extract_strided_slice %33 {offsets = [0, 64], sizes = [2, 32], strides = [1, 1]} : vector<2x96xf32> to vector<2x32xf32>
    %39 = arith.mulf %37, %22 : vector<2x32xf32>
    %40 = arith.mulf %36, %35 : vector<2x32xf32>
    %41 = arith.addf %39, %40 : vector<2x32xf32>
    %42 = math.tanh %41 : vector<2x32xf32>
    %43 = arith.mulf %38, %42 : vector<2x32xf32>
    %c0_27 = arith.constant 0 : index
    %c0_28 = arith.constant 0 : index
    %c0_29 = arith.constant 0 : index
    %44 = vector.load %arg5[%c0_27, %c0_28, %c0_29] : memref<2x8x32xf32, #tpu.memory_space<vmem>>, vector<2x1x32xf32>
    %45 = vector.shape_cast %44 : vector<2x1x32xf32> to vector<2x32xf32>
    %46 = vector.shape_cast %43 : vector<2x32xf32> to vector<2x1x32xf32>
    tpu.vector_store %arg5[%c0_27, %c0_28, %c0_29], %46 {strides = array<i32>} : memref<2x8x32xf32, #tpu.memory_space<vmem>>, vector<2x1x32xf32>,
    %c0_30 = arith.constant 0 : index
    %c1_31 = arith.constant 1 : index
    %c0_32 = arith.constant 0 : index
    %47 = vector.load %arg8[%c0_30, %c1_31, %c0_32] : memref<2x8x128xf32, #tpu.memory_space<vmem>>, vector<2x1x128xf32>
    %48 = vector.shape_cast %47 : vector<2x1x128xf32> to vector<2x128xf32>
    %cst_33 = arith.constant dense<0.000000e+00> : vector<2x128xf32>
    %49 = tpu.matmul %43, %23, %cst_33 {dimension_numbers = #tpu.dot_dimension_numbers<[1], [0], [0], [1], [0, 0, 1, 1], [], []>} : vector<2x32xf32>, vector<32x128xf32>, vector<2x128xf32> -> vector<2x128xf32>
    %50 = arith.addf %48, %49 : vector<2x128xf32>
    %51 = vector.extract_strided_slice %50 {offsets = [0, 0], sizes = [2, 96], strides = [1, 1]} : vector<2x128xf32> to vector<2x96xf32>
    %52 = arith.negf %51 : vector<2x96xf32>
    %53 = math.exp %52 : vector<2x96xf32>
    %cst_34 = arith.constant 1.000000e+00 : f32
    %54 = vector.broadcast %cst_34 : f32 to vector<2x96xf32>
    %55 = arith.addf %54, %53 : vector<2x96xf32>
    %56 = arith.divf %54, %55 : vector<2x96xf32>
    %57 = vector.extract_strided_slice %50 {offsets = [0, 96], sizes = [2, 32], strides = [1, 1]} : vector<2x128xf32> to vector<2x32xf32>
    %58 = math.tanh %57 : vector<2x32xf32>
    %59 = vector.extract_strided_slice %56 {offsets = [0, 0], sizes = [2, 32], strides = [1, 1]} : vector<2x96xf32> to vector<2x32xf32>
    %60 = vector.extract_strided_slice %56 {offsets = [0, 32], sizes = [2, 32], strides = [1, 1]} : vector<2x96xf32> to vector<2x32xf32>
    %61 = vector.extract_strided_slice %56 {offsets = [0, 64], sizes = [2, 32], strides = [1, 1]} : vector<2x96xf32> to vector<2x32xf32>
    %62 = arith.mulf %60, %41 : vector<2x32xf32>
    %63 = arith.mulf %59, %58 : vector<2x32xf32>
    %64 = arith.addf %62, %63 : vector<2x32xf32>
    %65 = math.tanh %64 : vector<2x32xf32>
    %66 = arith.mulf %61, %65 : vector<2x32xf32>
    %c0_35 = arith.constant 0 : index
    %c1_36 = arith.constant 1 : index
    %c0_37 = arith.constant 0 : index
    %67 = vector.load %arg5[%c0_35, %c1_36, %c0_37] : memref<2x8x32xf32, #tpu.memory_space<vmem>>, vector<2x1x32xf32>
    %68 = vector.shape_cast %67 : vector<2x1x32xf32> to vector<2x32xf32>
    %69 = vector.shape_cast %66 : vector<2x32xf32> to vector<2x1x32xf32>
    tpu.vector_store %arg5[%c0_35, %c1_36, %c0_37], %69 {strides = array<i32>} : memref<2x8x32xf32, #tpu.memory_space<vmem>>, vector<2x1x32xf32>,
    %c0_38 = arith.constant 0 : index
    %c2 = arith.constant 2 : index
    %c0_39 = arith.constant 0 : index
    %70 = vector.load %arg8[%c0_38, %c2, %c0_39] : memref<2x8x128xf32, #tpu.memory_space<vmem>>, vector<2x1x128xf32>
    %71 = vector.shape_cast %70 : vector<2x1x128xf32> to vector<2x128xf32>
    %cst_40 = arith.constant dense<0.000000e+00> : vector<2x128xf32>
    %72 = tpu.matmul %66, %23, %cst_40 {dimension_numbers = #tpu.dot_dimension_numbers<[1], [0], [0], [1], [0, 0, 1, 1], [], []>} : vector<2x32xf32>, vector<32x128xf32>, vector<2x128xf32> -> vector<2x128xf32>
    %73 = arith.addf %71, %72 : vector<2x128xf32>
    %74 = vector.extract_strided_slice %73 {offsets = [0, 0], sizes = [2, 96], strides = [1, 1]} : vector<2x128xf32> to vector<2x96xf32>
    %75 = arith.negf %74 : vector<2x96xf32>
    %76 = math.exp %75 : vector<2x96xf32>
    %cst_41 = arith.constant 1.000000e+00 : f32
    %77 = vector.broadcast %cst_41 : f32 to vector<2x96xf32>
    %78 = arith.addf %77, %76 : vector<2x96xf32>
    %79 = arith.divf %77, %78 : vector<2x96xf32>
    %80 = vector.extract_strided_slice %73 {offsets = [0, 96], sizes = [2, 32], strides = [1, 1]} : vector<2x128xf32> to vector<2x32xf32>
    %81 = math.tanh %80 : vector<2x32xf32>
    %82 = vector.extract_strided_slice %79 {offsets = [0, 0], sizes = [2, 32], strides = [1, 1]} : vector<2x96xf32> to vector<2x32xf32>
    %83 = vector.extract_strided_slice %79 {offsets = [0, 32], sizes = [2, 32], strides = [1, 1]} : vector<2x96xf32> to vector<2x32xf32>
    %84 = vector.extract_strided_slice %79 {offsets = [0, 64], sizes = [2, 32], strides = [1, 1]} : vector<2x96xf32> to vector<2x32xf32>
    %85 = arith.mulf %83, %64 : vector<2x32xf32>
    %86 = arith.mulf %82, %81 : vector<2x32xf32>
    %87 = arith.addf %85, %86 : vector<2x32xf32>
    %88 = math.tanh %87 : vector<2x32xf32>
    %89 = arith.mulf %84, %88 : vector<2x32xf32>
    %c0_42 = arith.constant 0 : index
    %c2_43 = arith.constant 2 : index
    %c0_44 = arith.constant 0 : index
    %90 = vector.load %arg5[%c0_42, %c2_43, %c0_44] : memref<2x8x32xf32, #tpu.memory_space<vmem>>, vector<2x1x32xf32>
    %91 = vector.shape_cast %90 : vector<2x1x32xf32> to vector<2x32xf32>
    %92 = vector.shape_cast %89 : vector<2x32xf32> to vector<2x1x32xf32>
    tpu.vector_store %arg5[%c0_42, %c2_43, %c0_44], %92 {strides = array<i32>} : memref<2x8x32xf32, #tpu.memory_space<vmem>>, vector<2x1x32xf32>,
    %c0_45 = arith.constant 0 : index
    %c3 = arith.constant 3 : index
    %c0_46 = arith.constant 0 : index
    %93 = vector.load %arg8[%c0_45, %c3, %c0_46] : memref<2x8x128xf32, #tpu.memory_space<vmem>>, vector<2x1x128xf32>
    %94 = vector.shape_cast %93 : vector<2x1x128xf32> to vector<2x128xf32>
    %cst_47 = arith.constant dense<0.000000e+00> : vector<2x128xf32>
    %95 = tpu.matmul %89, %23, %cst_47 {dimension_numbers = #tpu.dot_dimension_numbers<[1], [0], [0], [1], [0, 0, 1, 1], [], []>} : vector<2x32xf32>, vector<32x128xf32>, vector<2x128xf32> -> vector<2x128xf32>
    %96 = arith.addf %94, %95 : vector<2x128xf32>
    %97 = vector.extract_strided_slice %96 {offsets = [0, 0], sizes = [2, 96], strides = [1, 1]} : vector<2x128xf32> to vector<2x96xf32>
    %98 = arith.negf %97 : vector<2x96xf32>
    %99 = math.exp %98 : vector<2x96xf32>
    %cst_48 = arith.constant 1.000000e+00 : f32
    %100 = vector.broadcast %cst_48 : f32 to vector<2x96xf32>
    %101 = arith.addf %100, %99 : vector<2x96xf32>
    %102 = arith.divf %100, %101 : vector<2x96xf32>
    %103 = vector.extract_strided_slice %96 {offsets = [0, 96], sizes = [2, 32], strides = [1, 1]} : vector<2x128xf32> to vector<2x32xf32>
    %104 = math.tanh %103 : vector<2x32xf32>
    %105 = vector.extract_strided_slice %102 {offsets = [0, 0], sizes = [2, 32], strides = [1, 1]} : vector<2x96xf32> to vector<2x32xf32>
    %106 = vector.extract_strided_slice %102 {offsets = [0, 32], sizes = [2, 32], strides = [1, 1]} : vector<2x96xf32> to vector<2x32xf32>
    %107 = vector.extract_strided_slice %102 {offsets = [0, 64], sizes = [2, 32], strides = [1, 1]} : vector<2x96xf32> to vector<2x32xf32>
    %108 = arith.mulf %106, %87 : vector<2x32xf32>
    %109 = arith.mulf %105, %104 : vector<2x32xf32>
    %110 = arith.addf %108, %109 : vector<2x32xf32>
    %111 = math.tanh %110 : vector<2x32xf32>
    %112 = arith.mulf %107, %111 : vector<2x32xf32>
    %c0_49 = arith.constant 0 : index
    %c3_50 = arith.constant 3 : index
    %c0_51 = arith.constant 0 : index
    %113 = vector.load %arg5[%c0_49, %c3_50, %c0_51] : memref<2x8x32xf32, #tpu.memory_space<vmem>>, vector<2x1x32xf32>
    %114 = vector.shape_cast %113 : vector<2x1x32xf32> to vector<2x32xf32>
    %115 = vector.shape_cast %112 : vector<2x32xf32> to vector<2x1x32xf32>
    tpu.vector_store %arg5[%c0_49, %c3_50, %c0_51], %115 {strides = array<i32>} : memref<2x8x32xf32, #tpu.memory_space<vmem>>, vector<2x1x32xf32>,
    %c0_52 = arith.constant 0 : index
    %c4 = arith.constant 4 : index
    %c0_53 = arith.constant 0 : index
    %116 = vector.load %arg8[%c0_52, %c4, %c0_53] : memref<2x8x128xf32, #tpu.memory_space<vmem>>, vector<2x1x128xf32>
    %117 = vector.shape_cast %116 : vector<2x1x128xf32> to vector<2x128xf32>
    %cst_54 = arith.constant dense<0.000000e+00> : vector<2x128xf32>
    %118 = tpu.matmul %112, %23, %cst_54 {dimension_numbers = #tpu.dot_dimension_numbers<[1], [0], [0], [1], [0, 0, 1, 1], [], []>} : vector<2x32xf32>, vector<32x128xf32>, vector<2x128xf32> -> vector<2x128xf32>
    %119 = arith.addf %117, %118 : vector<2x128xf32>
    %120 = vector.extract_strided_slice %119 {offsets = [0, 0], sizes = [2, 96], strides = [1, 1]} : vector<2x128xf32> to vector<2x96xf32>
    %121 = arith.negf %120 : vector<2x96xf32>
    %122 = math.exp %121 : vector<2x96xf32>
    %cst_55 = arith.constant 1.000000e+00 : f32
    %123 = vector.broadcast %cst_55 : f32 to vector<2x96xf32>
    %124 = arith.addf %123, %122 : vector<2x96xf32>
    %125 = arith.divf %123, %124 : vector<2x96xf32>
    %126 = vector.extract_strided_slice %119 {offsets = [0, 96], sizes = [2, 32], strides = [1, 1]} : vector<2x128xf32> to vector<2x32xf32>
    %127 = math.tanh %126 : vector<2x32xf32>
    %128 = vector.extract_strided_slice %125 {offsets = [0, 0], sizes = [2, 32], strides = [1, 1]} : vector<2x96xf32> to vector<2x32xf32>
    %129 = vector.extract_strided_slice %125 {offsets = [0, 32], sizes = [2, 32], strides = [1, 1]} : vector<2x96xf32> to vector<2x32xf32>
    %130 = vector.extract_strided_slice %125 {offsets = [0, 64], sizes = [2, 32], strides = [1, 1]} : vector<2x96xf32> to vector<2x32xf32>
    %131 = arith.mulf %129, %110 : vector<2x32xf32>
    %132 = arith.mulf %128, %127 : vector<2x32xf32>
    %133 = arith.addf %131, %132 : vector<2x32xf32>
    %134 = math.tanh %133 : vector<2x32xf32>
    %135 = arith.mulf %130, %134 : vector<2x32xf32>
    %c0_56 = arith.constant 0 : index
    %c4_57 = arith.constant 4 : index
    %c0_58 = arith.constant 0 : index
    %136 = vector.load %arg5[%c0_56, %c4_57, %c0_58] : memref<2x8x32xf32, #tpu.memory_space<vmem>>, vector<2x1x32xf32>
    %137 = vector.shape_cast %136 : vector<2x1x32xf32> to vector<2x32xf32>
    %138 = vector.shape_cast %135 : vector<2x32xf32> to vector<2x1x32xf32>
    tpu.vector_store %arg5[%c0_56, %c4_57, %c0_58], %138 {strides = array<i32>} : memref<2x8x32xf32, #tpu.memory_space<vmem>>, vector<2x1x32xf32>,
    %c0_59 = arith.constant 0 : index
    %c5 = arith.constant 5 : index
    %c0_60 = arith.constant 0 : index
    %139 = vector.load %arg8[%c0_59, %c5, %c0_60] : memref<2x8x128xf32, #tpu.memory_space<vmem>>, vector<2x1x128xf32>
    %140 = vector.shape_cast %139 : vector<2x1x128xf32> to vector<2x128xf32>
    %cst_61 = arith.constant dense<0.000000e+00> : vector<2x128xf32>
    %141 = tpu.matmul %135, %23, %cst_61 {dimension_numbers = #tpu.dot_dimension_numbers<[1], [0], [0], [1], [0, 0, 1, 1], [], []>} : vector<2x32xf32>, vector<32x128xf32>, vector<2x128xf32> -> vector<2x128xf32>
    %142 = arith.addf %140, %141 : vector<2x128xf32>
    %143 = vector.extract_strided_slice %142 {offsets = [0, 0], sizes = [2, 96], strides = [1, 1]} : vector<2x128xf32> to vector<2x96xf32>
    %144 = arith.negf %143 : vector<2x96xf32>
    %145 = math.exp %144 : vector<2x96xf32>
    %cst_62 = arith.constant 1.000000e+00 : f32
    %146 = vector.broadcast %cst_62 : f32 to vector<2x96xf32>
    %147 = arith.addf %146, %145 : vector<2x96xf32>
    %148 = arith.divf %146, %147 : vector<2x96xf32>
    %149 = vector.extract_strided_slice %142 {offsets = [0, 96], sizes = [2, 32], strides = [1, 1]} : vector<2x128xf32> to vector<2x32xf32>
    %150 = math.tanh %149 : vector<2x32xf32>
    %151 = vector.extract_strided_slice %148 {offsets = [0, 0], sizes = [2, 32], strides = [1, 1]} : vector<2x96xf32> to vector<2x32xf32>
    %152 = vector.extract_strided_slice %148 {offsets = [0, 32], sizes = [2, 32], strides = [1, 1]} : vector<2x96xf32> to vector<2x32xf32>
    %153 = vector.extract_strided_slice %148 {offsets = [0, 64], sizes = [2, 32], strides = [1, 1]} : vector<2x96xf32> to vector<2x32xf32>
    %154 = arith.mulf %152, %133 : vector<2x32xf32>
    %155 = arith.mulf %151, %150 : vector<2x32xf32>
    %156 = arith.addf %154, %155 : vector<2x32xf32>
    %157 = math.tanh %156 : vector<2x32xf32>
    %158 = arith.mulf %153, %157 : vector<2x32xf32>
    %c0_63 = arith.constant 0 : index
    %c5_64 = arith.constant 5 : index
    %c0_65 = arith.constant 0 : index
    %159 = vector.load %arg5[%c0_63, %c5_64, %c0_65] : memref<2x8x32xf32, #tpu.memory_space<vmem>>, vector<2x1x32xf32>
    %160 = vector.shape_cast %159 : vector<2x1x32xf32> to vector<2x32xf32>
    %161 = vector.shape_cast %158 : vector<2x32xf32> to vector<2x1x32xf32>
    tpu.vector_store %arg5[%c0_63, %c5_64, %c0_65], %161 {strides = array<i32>} : memref<2x8x32xf32, #tpu.memory_space<vmem>>, vector<2x1x32xf32>,
    %c0_66 = arith.constant 0 : index
    %c6 = arith.constant 6 : index
    %c0_67 = arith.constant 0 : index
    %162 = vector.load %arg8[%c0_66, %c6, %c0_67] : memref<2x8x128xf32, #tpu.memory_space<vmem>>, vector<2x1x128xf32>
    %163 = vector.shape_cast %162 : vector<2x1x128xf32> to vector<2x128xf32>
    %cst_68 = arith.constant dense<0.000000e+00> : vector<2x128xf32>
    %164 = tpu.matmul %158, %23, %cst_68 {dimension_numbers = #tpu.dot_dimension_numbers<[1], [0], [0], [1], [0, 0, 1, 1], [], []>} : vector<2x32xf32>, vector<32x128xf32>, vector<2x128xf32> -> vector<2x128xf32>
    %165 = arith.addf %163, %164 : vector<2x128xf32>
    %166 = vector.extract_strided_slice %165 {offsets = [0, 0], sizes = [2, 96], strides = [1, 1]} : vector<2x128xf32> to vector<2x96xf32>
    %167 = arith.negf %166 : vector<2x96xf32>
    %168 = math.exp %167 : vector<2x96xf32>
    %cst_69 = arith.constant 1.000000e+00 : f32
    %169 = vector.broadcast %cst_69 : f32 to vector<2x96xf32>
    %170 = arith.addf %169, %168 : vector<2x96xf32>
    %171 = arith.divf %169, %170 : vector<2x96xf32>
    %172 = vector.extract_strided_slice %165 {offsets = [0, 96], sizes = [2, 32], strides = [1, 1]} : vector<2x128xf32> to vector<2x32xf32>
    %173 = math.tanh %172 : vector<2x32xf32>
    %174 = vector.extract_strided_slice %171 {offsets = [0, 0], sizes = [2, 32], strides = [1, 1]} : vector<2x96xf32> to vector<2x32xf32>
    %175 = vector.extract_strided_slice %171 {offsets = [0, 32], sizes = [2, 32], strides = [1, 1]} : vector<2x96xf32> to vector<2x32xf32>
    %176 = vector.extract_strided_slice %171 {offsets = [0, 64], sizes = [2, 32], strides = [1, 1]} : vector<2x96xf32> to vector<2x32xf32>
    %177 = arith.mulf %175, %156 : vector<2x32xf32>
    %178 = arith.mulf %174, %173 : vector<2x32xf32>
    %179 = arith.addf %177, %178 : vector<2x32xf32>
    %180 = math.tanh %179 : vector<2x32xf32>
    %181 = arith.mulf %176, %180 : vector<2x32xf32>
    %c0_70 = arith.constant 0 : index
    %c6_71 = arith.constant 6 : index
    %c0_72 = arith.constant 0 : index
    %182 = vector.load %arg5[%c0_70, %c6_71, %c0_72] : memref<2x8x32xf32, #tpu.memory_space<vmem>>, vector<2x1x32xf32>
    %183 = vector.shape_cast %182 : vector<2x1x32xf32> to vector<2x32xf32>
    %184 = vector.shape_cast %181 : vector<2x32xf32> to vector<2x1x32xf32>
    tpu.vector_store %arg5[%c0_70, %c6_71, %c0_72], %184 {strides = array<i32>} : memref<2x8x32xf32, #tpu.memory_space<vmem>>, vector<2x1x32xf32>,
    %c0_73 = arith.constant 0 : index
    %c7 = arith.constant 7 : index
    %c0_74 = arith.constant 0 : index
    %185 = vector.load %arg8[%c0_73, %c7, %c0_74] : memref<2x8x128xf32, #tpu.memory_space<vmem>>, vector<2x1x128xf32>
    %186 = vector.shape_cast %185 : vector<2x1x128xf32> to vector<2x128xf32>
    %cst_75 = arith.constant dense<0.000000e+00> : vector<2x128xf32>
    %187 = tpu.matmul %181, %23, %cst_75 {dimension_numbers = #tpu.dot_dimension_numbers<[1], [0], [0], [1], [0, 0, 1, 1], [], []>} : vector<2x32xf32>, vector<32x128xf32>, vector<2x128xf32> -> vector<2x128xf32>
    %188 = arith.addf %186, %187 : vector<2x128xf32>
    %189 = vector.extract_strided_slice %188 {offsets = [0, 0], sizes = [2, 96], strides = [1, 1]} : vector<2x128xf32> to vector<2x96xf32>
    %190 = arith.negf %189 : vector<2x96xf32>
    %191 = math.exp %190 : vector<2x96xf32>
    %cst_76 = arith.constant 1.000000e+00 : f32
    %192 = vector.broadcast %cst_76 : f32 to vector<2x96xf32>
    %193 = arith.addf %192, %191 : vector<2x96xf32>
    %194 = arith.divf %192, %193 : vector<2x96xf32>
    %195 = vector.extract_strided_slice %188 {offsets = [0, 96], sizes = [2, 32], strides = [1, 1]} : vector<2x128xf32> to vector<2x32xf32>
    %196 = math.tanh %195 : vector<2x32xf32>
    %197 = vector.extract_strided_slice %194 {offsets = [0, 0], sizes = [2, 32], strides = [1, 1]} : vector<2x96xf32> to vector<2x32xf32>
    %198 = vector.extract_strided_slice %194 {offsets = [0, 32], sizes = [2, 32], strides = [1, 1]} : vector<2x96xf32> to vector<2x32xf32>
    %199 = vector.extract_strided_slice %194 {offsets = [0, 64], sizes = [2, 32], strides = [1, 1]} : vector<2x96xf32> to vector<2x32xf32>
    %200 = arith.mulf %198, %179 : vector<2x32xf32>
    %201 = arith.mulf %197, %196 : vector<2x32xf32>
    %202 = arith.addf %200, %201 : vector<2x32xf32>
    %203 = math.tanh %202 : vector<2x32xf32>
    %204 = arith.mulf %199, %203 : vector<2x32xf32>
    %c0_77 = arith.constant 0 : index
    %c7_78 = arith.constant 7 : index
    %c0_79 = arith.constant 0 : index
    %205 = vector.load %arg5[%c0_77, %c7_78, %c0_79] : memref<2x8x32xf32, #tpu.memory_space<vmem>>, vector<2x1x32xf32>
    %206 = vector.shape_cast %205 : vector<2x1x32xf32> to vector<2x32xf32>
    %207 = vector.shape_cast %204 : vector<2x32xf32> to vector<2x1x32xf32>
    tpu.vector_store %arg5[%c0_77, %c7_78, %c0_79], %207 {strides = array<i32>} : memref<2x8x32xf32, #tpu.memory_space<vmem>>, vector<2x1x32xf32>,
    %c0_80 = arith.constant 0 : index
    %c0_81 = arith.constant 0 : index
    %208 = vector.load %arg6[%c0_80, %c0_81] : memref<2x32xf32, #tpu.memory_space<vmem>>, vector<2x32xf32>
    tpu.vector_store %arg6[%c0_80, %c0_81], %204 {strides = array<i32>} : memref<2x32xf32, #tpu.memory_space<vmem>>, vector<2x32xf32>,
    %c0_82 = arith.constant 0 : index
    %c0_83 = arith.constant 0 : index
    %209 = vector.load %arg7[%c0_82, %c0_83] : memref<2x32xf32, #tpu.memory_space<vmem>>, vector<2x32xf32>
    tpu.vector_store %arg7[%c0_82, %c0_83], %202 {strides = array<i32>} : memref<2x32xf32, #tpu.memory_space<vmem>>, vector<2x32xf32>,
    return
  }
  func.func @transform_0(%arg0: i32) -> (i32, i32, i32) {
    %c0_i32 = arith.constant 0 : i32
    %c0_i32_0 = arith.constant 0 : i32
    %c0_i32_1 = arith.constant 0 : i32
    return %c0_i32, %arg0, %c0_i32_0 : i32, i32, i32
  }
  func.func @transform_1(%arg0: i32) -> (i32, i32) {
    %c0_i32 = arith.constant 0 : i32
    %c0_i32_0 = arith.constant 0 : i32
    %c0_i32_1 = arith.constant 0 : i32
    return %c0_i32, %c0_i32_0 : i32, i32
  }
  func.func @transform_2(%arg0: i32) -> (i32, i32) {
    %c0_i32 = arith.constant 0 : i32
    %c0_i32_0 = arith.constant 0 : i32
    %c0_i32_1 = arith.constant 0 : i32
    return %c0_i32, %c0_i32_0 : i32, i32
  }
  func.func @transform_3(%arg0: i32) -> (i32, i32) {
    %c0_i32 = arith.constant 0 : i32
    %c0_i32_0 = arith.constant 0 : i32
    %c0_i32_1 = arith.constant 0 : i32
    return %c0_i32, %c0_i32_0 : i32, i32
  }
  func.func @transform_4(%arg0: i32) -> (i32, i32, i32) {
    %c0_i32 = arith.constant 0 : i32
    %c0_i32_0 = arith.constant 0 : i32
    %c0_i32_1 = arith.constant 0 : i32
    return %c0_i32, %arg0, %c0_i32_0 : i32, i32, i32
  }
  func.func @transform_5(%arg0: i32) -> (i32, i32) {
    %c0_i32 = arith.constant 0 : i32
    %c0_i32_0 = arith.constant 0 : i32
    %c0_i32_1 = arith.constant 0 : i32
    return %c0_i32, %c0_i32_0 : i32, i32
  }
  func.func @transform_6(%arg0: i32) -> (i32, i32) {
    %c0_i32 = arith.constant 0 : i32
    %c0_i32_0 = arith.constant 0 : i32
    %c0_i32_1 = arith.constant 0 : i32
    return %c0_i32, %c0_i32_0 : i32, i32
  }
}

</mosaic_0001>

<bundles_post_ra>
// kernel: tpu_custom_call.1
= control target key start
LH: loop header
LB: loop body
LE: loop exit
PB: predicated region body
PF: predicated region fallthrough
CT: control target
= control target key end

     0   :  { %12 = vsyncpa [#allocation4], 0  ;;  %s2326_s0 = inlined_call_operand.hbm [shape: f32[2,8,16], index: 0, kind: input, shape index: {}]   ;;  %s2327_s1 = inlined_call_operand.hbm [shape: f32[16,128], index: 1, kind: input, shape index: {}]   ;;  %s2328_s2 = inlined_call_operand.hbm [shape: f32[32,128], index: 2, kind: input, shape index: {}]   ;;  %s2329_s3 = inlined_call_operand.vmem [shape: f32[1,128], index: 3, kind: input, shape index: {}]   ;;  %s2330_s4 = inlined_call_operand.hbm [shape: f32[2,8,32], index: 4, kind: output, shape index: {0}]   ;;  %s2331_s5 = inlined_call_operand.hbm [shape: f32[2,32], index: 5, kind: output, shape index: {1}]   ;;  %s2332_s6 = inlined_call_operand.hbm [shape: f32[2,32], index: 6, kind: output, shape index: {2}]  }
   0x1   :  { %13 = vsyncpa [#allocation7], 0 }
   0x2   :  { %14 = vsyncpa [#allocation5], 0 }
   0x3   :  { %15 = vsyncpa [#allocation11], 0  ;;  %s1953_s21 = smov [#allocation6]   ;;  %s1954_s23 = smov [#allocation3]  }
   0x4   :  { %s33_s22 = sshll.u32 %s1953_s21, 4  ;;  %s21_s24 = sshll.u32 %s1954_s23, 4  ;;  %s34_s22 = int_to_ptr.vmem [resolvable:$true] %s33_s22  ;;  %s2002_s24 = int_to_ptr.vmem [resolvable:$true] %s21_s24 }
   0x5   :  { %s1813_s27 = scalar_lea.hbm %s2327_s1, 256 }
   0x6   :  { %p1814_p0 = scmp.ne.s32.totalorder %s2327_s1, %s1813_s27  ;;  %p1817_p1 = scmp.lt.u32.totalorder %s1813_s27, %s2327_s1 }
   0x8   :  { %p1819_p2 = pnand %p1817_p1, %p1814_p0 }
   0xa   :  { %1822 = shalt.err (!%p1819_p2)
}
   0xb   :  { %s1823_s8 = scalar_lea.vmem %s34_s22, 256  ;;  %p1828_p4 = scmp.lt.s32.totalorder %s34_s22, %s34_s22 }
   0xc   :  { %p1824_p3 = scmp.ne.s32.totalorder %s34_s22, %s1823_s8  ;;  %p1829_p5 = scmp.lt.s32.totalorder %s1823_s8, %s1823_s8 }
   0xe   :  { %p1830_p6 = por %p1829_p5, %p1828_p4 }
  0x10   :  { %p1831_p7 = pnand %p1830_p6, %p1824_p3 }
  0x12   :  { %1834 = shalt.err (!%p1831_p7)
}
  0x13   :  { %s1955_s9 = smov 128   ;;  %s1956_s10 = smov 8  }
  0x14   :  { %39 = dma.hbm_to_vmem [thread:$0]  %s2327_s1, 256, %s34_s22, [#allocation7], %s1955_s9, %s1955_s9, %s1956_s10  }
  0x15   :  { %s1835_s15 = scalar_lea.hbm %s2326_s0, 256 }
  0x16   :  { %p1836_p8 = scmp.ne.s32.totalorder %s2326_s0, %s1835_s15  ;;  %p1839_p9 = scmp.lt.u32.totalorder %s1835_s15, %s2326_s0 }
  0x18   :  { %p1841_p10 = pnand %p1839_p9, %p1836_p8 }
  0x1a   :  { %1844 = shalt.err (!%p1841_p10)
}
  0x1b   :  { %s1845_s20 = scalar_lea.vmem %s2002_s24, 256  ;;  %p1850_p12 = scmp.lt.s32.totalorder %s2002_s24, %s2002_s24 }
  0x1c   :  { %p1846_p11 = scmp.ne.s32.totalorder %s2002_s24, %s1845_s20  ;;  %p1851_p13 = scmp.lt.s32.totalorder %s1845_s20, %s1845_s20 }
  0x1e   :  { %p1852_p0 = por %p1851_p13, %p1850_p12 }
  0x20   :  { %p1853_p1 = pnand %p1852_p0, %p1846_p11 }
  0x22   :  { %1856 = shalt.err (!%p1853_p1)
}
  0x23   :  { %27 = dma.hbm_to_vmem [thread:$0]  %s2326_s0, 256, %s2002_s24, [#allocation4], %s1955_s9, %s1955_s9, %s1956_s10  }
  0x24   :  { %s1957_s22 = smov [#allocation8]   ;;  %s1857_s27 = scalar_lea.hbm %s2328_s2, 512 }
  0x25   :  { %s45_s23 = sshll.u32 %s1957_s22, 4  ;;  %p1858_p2 = scmp.ne.s32.totalorder %s2328_s2, %s1857_s27  ;;  %s46_s23 = int_to_ptr.vmem [resolvable:$true] %s45_s23 }
  0x26   :  { %p1861_p3 = scmp.lt.u32.totalorder %s1857_s27, %s2328_s2 }
  0x28   :  { %p1863_p4 = pnand %p1861_p3, %p1858_p2 }
  0x2a   :  { %1866 = shalt.err (!%p1863_p4)
}
  0x2b   :  { %s1867_s8 = scalar_lea.vmem %s46_s23, 512  ;;  %p1872_p6 = scmp.lt.s32.totalorder %s46_s23, %s46_s23 }
  0x2c   :  { %p1868_p5 = scmp.ne.s32.totalorder %s46_s23, %s1867_s8  ;;  %p1873_p7 = scmp.lt.s32.totalorder %s1867_s8, %s1867_s8 }
  0x2e   :  { %p1874_p8 = por %p1873_p7, %p1872_p6 }
  0x30   :  { %p1875_p9 = pnand %p1874_p8, %p1868_p5 }
  0x32   :  { %1878 = shalt.err (!%p1875_p9)
}
  0x33   :  { %51 = dma.hbm_to_vmem [thread:$0]  %s2328_s2, 512, %s46_s23, [#allocation7], %s1955_s9, %s1955_s9, %s1956_s10  }
  0x34   :  { %1945 = dma.done.wait [#allocation4], 256  }
  0x35   :  { %1946 = vsyncadd [#allocation4], 4294967040 }
  0x36   :  { %1947 = dma.done.wait [#allocation7], 768  }
  0x37   :  { %1948 = vsyncadd [#allocation7], 4294966528  ;;  %v1958_v0 = vmov 0.0|0.0   ;;  %vm67_vm0 = vcmask 254976   ;;  %vm1959_vm1 = vmmov 0   ;;  %v1960_v1 = vmov 0.0  }
  0x38   :  { %1617 = vmatprep.subr.bf16.mxu0 %v1958_v0  ;;  %1620 = vmatprep.subr.bf16.mxu1 %v1958_v0  ;;  %68 = vst.msk [vmem:[#allocation10] sm:$0x3] %vm67_vm0, %v1960_v1  ;;  %69 = vst.msk [vmem:[#allocation12] sm:$0x3] %vm67_vm0, %v1960_v1  ;;  %v70_v2 = vld [vmem:[#allocation6] sm:$0xff]  ;;  %v71_v3 = vld [vmem:[#allocation6 + $0x8] sm:$0xff] }
  0x39   :  { %1519 = vmatprep.mubr.msk.f32.mxu0 %vm1959_vm1, %v1960_v1  ;;  %1526 = vmatprep.mubr.msk.f32.mxu1 %vm1959_vm1, %v1960_v1  ;;  %v1618_v4 = vpack.c.bf16 %v71_v3, %v70_v2  ;;  %v234_v5 = vld [vmem:[#allocation8] sm:$0xff]  ;;  %v235_v6 = vld [vmem:[#allocation8 + $0x8] sm:$0xff]  ;;  %vm80_vm2 = vcmask 130048   ;;  %v236_v11 = vld [vmem:[#allocation8 + $0x10] sm:$0xff]  ;;  %s1961_s2 = smov 32   ;;  %vm240_vm3 = vcmask 261120  }
  0x3a   :  { %v73_v7 = vld [vmem:[#allocation3] sm:$0xff]  ;;  %v156_v8 = vld [vmem:[#allocation3 + $0x8] sm:$0xff]  ;;  %v2064_v9 = vpack.c.bf16 %v235_v6, %v234_v5  ;;  %v237_v12 = vld [vmem:[#allocation8 + $0x18] sm:$0xff]  ;;  %vm390_vm4 = vcmask 1041409   ;;  %vm384_vm5 = vcmask 253952   ;;  %s1963_s13 = smov 96  }
  0x3b   :  { %1619 = vmatpush3.bf16.msra.mxu0 %v1618_v4  ;;  %1622 = vmatpush3.bf16.msra.mxu1 %v1618_v4  ;;  %v2069_v14 = vpack.c.bf16 %v237_v12, %v236_v11  ;;  %v1442_v16 = vld [vmem:[%s2329_s3] ss:$0 sm:$0xff]  ;;  %s1962_s3 = smov 64   ;;  %s1964_s14 = smov [#allocation10]  }
  0x3c   :  { %1623 = vmatprep.subr.bf16.mxu0 %v1958_v0  ;;  %1629 = vmatprep.subr.bf16.mxu1 %v1958_v0  ;;  %s1415_s15 = sshll.u32 %s1964_s14, 4  ;;  %s1965_s16 = smov [#allocation12]   ;;  %s1416_s15 = int_to_ptr.vmem [resolvable:$true] %s1415_s15 }
  0x3d   :  { %s1425_s17 = sshll.u32 %s1965_s16, 4  ;;  %s1966_s18 = smov [#allocation9]   ;;  %s1426_s17 = int_to_ptr.vmem [resolvable:$true] %s1425_s17 }
  0x3e   :  { %1520 = vmatmul.mubr.msk.f32.vlgmr.msra.gmra.mrb[0].mxu0 %vm80_vm2, %v73_v7  ;;  %1527 = vmatmul.mubr.msk.f32.vlgmr.msra.gmra.mrb[0].mxu1 %vm80_vm2, %v156_v8  ;;  %s1402_s19 = sshll.u32 %s1966_s18, 4  ;;  %s1879_s20 = scalar_lea.vmem %s1416_s15, 32  ;;  %s2279_s19 = int_to_ptr.vmem [resolvable:$true] %s1402_s19 }
  0x3f   :  { %v233_v10 = vld [vmem:[#allocation12] sm:$0x3]  ;;  %1625 = vmatpush3.bf16.msra.mxu0 %v2064_v9  ;;  %1537 = vmatprep.mubr.msk.f32.mxu0 %vm1959_vm1, %v1960_v1  ;;  %v232_v15 = vld [vmem:[#allocation10] sm:$0x3]  ;;  %p1880_p10 = scmp.ne.s32.totalorder %s1416_s15, %s1879_s20  ;;  %p1884_p11 = scmp.lt.s32.totalorder %s1416_s15, %s1416_s15 }
  0x40   :  { %v335_v13 = vrot.slane %v233_v10, 1  ;;  %1626 = vmatprep.subr.bf16.mxu0 %v1958_v0  ;;  %1631 = vmatpush3.bf16.msra.mxu1 %v2064_v9  ;;  %p1885_p12 = scmp.lt.s32.totalorder %s1879_s20, %s1879_s20 }
  0x41   :  { %1548 = vmatprep.mubr.msk.f32.mxu1 %vm1959_vm1, %v1960_v1  ;;  %1632 = vmatprep.subr.bf16.mxu1 %v1958_v0 }
  0x42   :  { %338 = vrot.lane.b32.xlu1 %v335_v13, %s1961_s2  ;;  %p1886_p13 = por %p1885_p12, %p1884_p11 }
  0x43   :  { %1628 = vmatpush3.bf16.msra.mxu0 %v2069_v14 }
  0x44   :  { %1635 = vmatprep.subr.bf16.mxu0 %v1958_v0  ;;  %1634 = vmatpush3.bf16.msra.mxu1 %v2069_v14  ;;  %p1887_p0 = pnand %p1886_p13, %p1880_p10 }
  0x45   :  { %1641 = vmatprep.subr.bf16.mxu1 %v1958_v0 }
  0x46   :  { %336 = vrot.lane.b32.xlu1 %v233_v10, %s1961_s2  ;;  %1538 = vmatmul.mubr.msk.f32.vlgmr.msra.gmra.mrb[2].mxu0 %vm240_vm3, %v232_v15 }
  0x47   :  { %1637 = vmatpush3.bf16.msra.mxu0 %v2064_v9  ;;  %1559 = vmatprep.mubr.msk.f32.mxu0 %vm1959_vm1, %v1960_v1 }
  0x48   :  { %1638 = vmatprep.subr.bf16.mxu0 %v1958_v0 }
  0x4b   :  { %1640 = vmatpush3.bf16.msra.mxu0 %v2069_v14 }
  0x4c   :  { %1647 = vmatprep.subr.bf16.mxu0 %v1958_v0 }
  0xb4   :  { %v339_v44 = vpop.permute.xlu1 %338 }
  0xb8   :  { %v337_v46 = vpop.permute.xlu1 %336 }
 0x111   :  { %v150_v17 = vpop.f32.mrb[0].mxu0  ;;  %v226_v18 = vpop.f32.mrb[0].mxu1 }
 0x112   :  { %v151_v19 = vadd.f32 %v1442_v16, %v150_v17  ;;  %v227_v20 = vadd.f32 %v1442_v16, %v226_v18  ;;  %v1521_v21 = vpop.f32.mrb[1].mxu0  ;;  %v1528_v22 = vpop.f32.mrb[1].mxu1 }
 0x114   :  { %154 = vst [vmem:[#allocation2] sm:$0xff] %v151_v19  ;;  %231 = vst [vmem:[#allocation2 + $0x8] sm:$0xff] %v227_v20 }
 0x119   :  { %v310_v23 = vpop.f32.mrb[2].mxu0 }
 0x11a   :  { %v315_v24 = vrot.slane %v310_v23, 1  ;;  %v1539_v25 = vpop.f32.mrb[3].mxu0 }
 0x11b   :  { %v239_v26 = vld [vmem:[#allocation2 + $0x8] sm:$0x1]  ;;  %v238_v27 = vld [vmem:[#allocation2] sm:$0x1]  ;;  %v387_v61 = vld [vmem:[#allocation2 + $0x1] sm:$0x1] }
 0x11c   :  { %v319_v28 = vadd.f32 %v315_v24, %v239_v26  ;;  %v318_v29 = vadd.f32 %v310_v23, %v238_v27  ;;  %v388_v4 = vld [vmem:[#allocation2 + $0x9] sm:$0x1] }
 0x11e   :  { %1685 = vtanh.f32 %v319_v28  ;;  %v1447_v32 = vmul.f32 -1.442695, %v319_v28  ;;  %v1446_v33 = vmul.f32 -1.442695, %v318_v29 }
 0x11f   :  { %1687 = vtanh.f32 %v318_v29 }
 0x120   :  { %1689 = vpow2.f32 %v1447_v32 }
 0x121   :  { %1691 = vpow2.f32 %v1446_v33 }
 0x128   :  { %v1686_v30 = vpop.eup %1685 }
 0x129   :  { %348 = vrot.lane.b32.xlu0 %v1686_v30, %s1961_s2  ;;  %v1688_v31 = vpop.eup %1687 }
 0x12a   :  { %v1690_v34 = vpop.eup %1689 }
 0x12b   :  { %v327_v35 = vadd.f32 1.0, %v1690_v34  ;;  %v1692_v36 = vpop.eup %1691 }
 0x12c   :  { %v326_v37 = vadd.f32 1.0, %v1692_v36 }
 0x12d   :  { %346 = vrot.lane.b32.xlu0 %v1688_v31, %s1961_s2  ;;  %1693 = vrcp.f32 %v327_v35 }
 0x12e   :  { %1695 = vrcp.f32 %v326_v37  ;;  %v530_v37 = vld [vmem:[#allocation2 + $0x2] sm:$0x1] }
 0x137   :  { %v1694_v38 = vpop.eup %1693 }
 0x138   :  { %v1696_v41 = vpop.eup %1695  ;;  %v343_v45 = vmul.f32 %v1694_v38, %v339_v44 }
 0x139   :  { %v342_v49 = vmul.f32 %v1696_v41, %v337_v46 }
 0x19b   :  { %v349_v39 = vpop.permute.xlu0 %348 }
 0x19c   :  { %v353_v40 = vmul.f32 %v1694_v38, %v349_v39 }
 0x19e   :  { %358 = vrot.lane.b32.xlu0 %v353_v40, %s1961_s2 }
 0x19f   :  { %v347_v42 = vpop.permute.xlu0 %346 }
 0x1a0   :  { %v352_v43 = vmul.f32 %v1696_v41, %v347_v42  ;;  %v531_v42 = vld [vmem:[#allocation2 + $0xa] sm:$0x1] }
 0x1a2   :  { %356 = vrot.lane.b32.xlu1 %v352_v43, %s1961_s2 }
 0x210   :  { %v359_v47 = vpop.permute.xlu0 %358 }
 0x211   :  { %v363_v48 = vadd.f32 %v359_v47, %v343_v45 }
 0x213   :  { %1697 = vtanh.f32 %v363_v48 }
 0x214   :  { %v357_v50 = vpop.permute.xlu1 %356 }
 0x215   :  { %v362_v51 = vadd.f32 %v357_v50, %v342_v49 }
 0x217   :  { %1699 = vtanh.f32 %v362_v51 }
 0x21d   :  { %v1698_v52 = vpop.eup %1697 }
 0x21e   :  { %370 = vrot.lane.b32.xlu0 %v1698_v52, %s1961_s2 }
 0x221   :  { %v1700_v53 = vpop.eup %1699 }
 0x222   :  { %368 = vrot.lane.b32.xlu1 %v1700_v53, %s1961_s2 }
 0x290   :  { %v371_v54 = vpop.permute.xlu0 %370 }
 0x291   :  { %v2100_v55 = vmul.f32 %v1694_v38, %v371_v54 }
 0x293   :  { %v389_v57 = vrot.slane %v2100_v55, 7 }
 0x294   :  { %v369_v56 = vpop.permute.xlu1 %368 }
 0x295   :  { %v2103_v58 = vmul.f32 %v1696_v41, %v369_v56 }
 0x297   :  { %v391_v59 = vsel %vm390_vm4, %v389_v57, %v2103_v58 }
 0x298   :  { %392 = vrot.lane.b32.xlu0 %v391_v59, %s1962_s3 }
 0x30a   :  { %v393_v60 = vpop.permute.xlu0 %392 }
 0x30b   :  { %1549 = vmatmul.mubr.msk.f32.vlgmr.msra.gmra.mrb[2].mxu1 %vm240_vm3, %v393_v60 }
 0x30c   :  { %1643 = vmatpush3.bf16.msra.mxu1 %v2064_v9  ;;  %1570 = vmatprep.mubr.msk.f32.mxu1 %vm1959_vm1, %v1960_v1 }
 0x30d   :  { %1644 = vmatprep.subr.bf16.mxu1 %v1958_v0 }
 0x310   :  { %1646 = vmatpush3.bf16.msra.mxu1 %v2069_v14 }
 0x311   :  { %1653 = vmatprep.subr.bf16.mxu1 %v1958_v0 }
 0x3de   :  { %v462_v62 = vpop.f32.mrb[2].mxu1 }
 0x3df   :  { %v467_v63 = vrot.slane %v462_v62, 1  ;;  %v470_v2 = vadd.f32 %v462_v62, %v387_v61  ;;  %v1550_v3 = vpop.f32.mrb[3].mxu1 }
 0x3e1   :  { %v471_v5 = vadd.f32 %v467_v63, %v388_v4  ;;  %1701 = vtanh.f32 %v470_v2  ;;  %v1449_v8 = vmul.f32 -1.442695, %v470_v2 }
 0x3e3   :  { %1703 = vtanh.f32 %v471_v5  ;;  %v1450_v10 = vmul.f32 -1.442695, %v471_v5 }
 0x3e4   :  { %1705 = vpow2.f32 %v1449_v8 }
 0x3e5   :  { %1707 = vpow2.f32 %v1450_v10 }
 0x3eb   :  { %v1702_v6 = vpop.eup %1701 }
 0x3ec   :  { %490 = vrot.lane.b32.xlu0 %v1702_v6, %s1961_s2 }
 0x3ed   :  { %v1704_v7 = vpop.eup %1703 }
 0x3ee   :  { %492 = vrot.lane.b32.xlu1 %v1704_v7, %s1961_s2  ;;  %v1706_v11 = vpop.eup %1705 }
 0x3ef   :  { %v1708_v12 = vpop.eup %1707  ;;  %v478_v13 = vadd.f32 1.0, %v1706_v11 }
 0x3f0   :  { %v479_v15 = vadd.f32 1.0, %v1708_v12 }
 0x3f1   :  { %1709 = vrcp.f32 %v478_v13 }
 0x3f2   :  { %1711 = vrcp.f32 %v479_v15  ;;  %v672_v15 = vld [vmem:[#allocation2 + $0x3] sm:$0x1] }
 0x3fb   :  { %v1710_v16 = vpop.eup %1709 }
 0x3fc   :  { %v1712_v19 = vpop.eup %1711  ;;  %v486_v22 = vmul.f32 %v1710_v16, %v362_v51 }
 0x3fd   :  { %v487_v25 = vmul.f32 %v1712_v19, %v363_v48 }
 0x45e   :  { %v491_v17 = vpop.permute.xlu0 %490 }
 0x45f   :  { %v496_v18 = vmul.f32 %v1710_v16, %v491_v17 }
 0x460   :  { %v493_v20 = vpop.permute.xlu1 %492 }
 0x461   :  { %500 = vrot.lane.b32.xlu0 %v496_v18, %s1961_s2  ;;  %v497_v21 = vmul.f32 %v1712_v19, %v493_v20  ;;  %v673_v20 = vld [vmem:[#allocation2 + $0xb] sm:$0x1] }
 0x463   :  { %502 = vrot.lane.b32.xlu1 %v497_v21, %s1961_s2 }
 0x4d3   :  { %v501_v23 = vpop.permute.xlu0 %500 }
 0x4d4   :  { %v506_v24 = vadd.f32 %v501_v23, %v486_v22 }
 0x4d5   :  { %v503_v26 = vpop.permute.xlu1 %502 }
 0x4d6   :  { %1713 = vtanh.f32 %v506_v24  ;;  %v507_v27 = vadd.f32 %v503_v26, %v487_v25 }
 0x4d8   :  { %1715 = vtanh.f32 %v507_v27 }
 0x4e0   :  { %v1714_v28 = vpop.eup %1713 }
 0x4e1   :  { %512 = vrot.lane.b32.xlu0 %v1714_v28, %s1961_s2 }
 0x4e2   :  { %v1716_v29 = vpop.eup %1715 }
 0x4e3   :  { %514 = vrot.lane.b32.xlu1 %v1716_v29, %s1961_s2 }
 0x553   :  { %v513_v30 = vpop.permute.xlu0 %512 }
 0x554   :  { %v2123_v33 = vmul.f32 %v1710_v16, %v513_v30 }
 0x555   :  { %v515_v31 = vpop.permute.xlu1 %514 }
 0x556   :  { %v2121_v32 = vmul.f32 %v1712_v19, %v515_v31 }
 0x558   :  { %v532_v34 = vrot.slane %v2121_v32, 7 }
 0x55a   :  { %v533_v35 = vsel %vm390_vm4, %v532_v34, %v2123_v33 }
 0x55b   :  { %534 = vrot.lane.b32.xlu1 %v533_v35, %s1962_s3 }
 0x5cd   :  { %v535_v36 = vpop.permute.xlu1 %534 }
 0x5ce   :  { %1560 = vmatmul.mubr.msk.f32.vlgmr.msra.gmra.mrb[4].mxu0 %vm240_vm3, %v535_v36 }
 0x5cf   :  { %1649 = vmatpush3.bf16.msra.mxu0 %v2064_v9  ;;  %1581 = vmatprep.mubr.msk.f32.mxu0 %vm1959_vm1, %v1960_v1 }
 0x5d0   :  { %1650 = vmatprep.subr.bf16.mxu0 %v1958_v0 }
 0x5d3   :  { %1652 = vmatpush3.bf16.msra.mxu0 %v2069_v14 }
 0x5d4   :  { %1659 = vmatprep.subr.bf16.mxu0 %v1958_v0 }
 0x6a1   :  { %v604_v38 = vpop.f32.mrb[4].mxu0 }
 0x6a2   :  { %v609_v39 = vrot.slane %v604_v38, 1  ;;  %v612_v40 = vadd.f32 %v604_v38, %v530_v37  ;;  %v1561_v41 = vpop.f32.mrb[5].mxu0 }
 0x6a4   :  { %v613_v43 = vadd.f32 %v609_v39, %v531_v42  ;;  %1717 = vtanh.f32 %v612_v40  ;;  %v1452_v46 = vmul.f32 -1.442695, %v612_v40 }
 0x6a6   :  { %1719 = vtanh.f32 %v613_v43  ;;  %v1453_v47 = vmul.f32 -1.442695, %v613_v43 }
 0x6a7   :  { %1721 = vpow2.f32 %v1452_v46 }
 0x6a8   :  { %1723 = vpow2.f32 %v1453_v47 }
 0x6ae   :  { %v1718_v44 = vpop.eup %1717 }
 0x6af   :  { %632 = vrot.lane.b32.xlu1 %v1718_v44, %s1961_s2 }
 0x6b0   :  { %v1720_v45 = vpop.eup %1719 }
 0x6b1   :  { %634 = vrot.lane.b32.xlu0 %v1720_v45, %s1961_s2  ;;  %v1722_v48 = vpop.eup %1721 }
 0x6b2   :  { %v1724_v49 = vpop.eup %1723  ;;  %v620_v50 = vadd.f32 1.0, %v1722_v48 }
 0x6b3   :  { %v621_v51 = vadd.f32 1.0, %v1724_v49 }
 0x6b4   :  { %1725 = vrcp.f32 %v620_v50 }
 0x6b5   :  { %1727 = vrcp.f32 %v621_v51 }
 0x6be   :  { %v1726_v52 = vpop.eup %1725 }
 0x6bf   :  { %v1728_v56 = vpop.eup %1727  ;;  %v628_v60 = vmul.f32 %v1726_v52, %v506_v24 }
 0x6c0   :  { %v629_v63 = vmul.f32 %v1728_v56, %v507_v27 }
 0x721   :  { %v633_v53 = vpop.permute.xlu1 %632 }
 0x722   :  { %v638_v54 = vmul.f32 %v1726_v52, %v633_v53  ;;  %v814_v53 = vld [vmem:[#allocation2 + $0x4] sm:$0x1] }
 0x723   :  { %v635_v57 = vpop.permute.xlu0 %634 }
 0x724   :  { %642 = vrot.lane.b32.xlu1 %v638_v54, %s1961_s2  ;;  %v639_v59 = vmul.f32 %v1728_v56, %v635_v57 }
 0x726   :  { %644 = vrot.lane.b32.xlu0 %v639_v59, %s1961_s2 }
 0x796   :  { %v643_v61 = vpop.permute.xlu1 %642 }
 0x797   :  { %v648_v62 = vadd.f32 %v643_v61, %v628_v60  ;;  %v815_v60 = vld [vmem:[#allocation2 + $0xc] sm:$0x1] }
 0x798   :  { %v645_v2 = vpop.permute.xlu0 %644 }
 0x799   :  { %1729 = vtanh.f32 %v648_v62  ;;  %v649_v3 = vadd.f32 %v645_v2, %v629_v63 }
 0x79b   :  { %1731 = vtanh.f32 %v649_v3 }
 0x7a3   :  { %v1730_v4 = vpop.eup %1729 }
 0x7a4   :  { %654 = vrot.lane.b32.xlu1 %v1730_v4, %s1961_s2 }
 0x7a5   :  { %v1732_v5 = vpop.eup %1731 }
 0x7a6   :  { %656 = vrot.lane.b32.xlu0 %v1732_v5, %s1961_s2 }
 0x816   :  { %v655_v6 = vpop.permute.xlu1 %654 }
 0x817   :  { %v2144_v10 = vmul.f32 %v1726_v52, %v655_v6 }
 0x818   :  { %v657_v7 = vpop.permute.xlu0 %656 }
 0x819   :  { %v2142_v8 = vmul.f32 %v1728_v56, %v657_v7 }
 0x81b   :  { %v674_v11 = vrot.slane %v2142_v8, 7 }
 0x81d   :  { %v675_v12 = vsel %vm390_vm4, %v674_v11, %v2144_v10 }
 0x81e   :  { %676 = vrot.lane.b32.xlu0 %v675_v12, %s1962_s3 }
 0x890   :  { %v677_v13 = vpop.permute.xlu0 %676 }
 0x891   :  { %1571 = vmatmul.mubr.msk.f32.vlgmr.msra.gmra.mrb[4].mxu1 %vm240_vm3, %v677_v13 }
 0x892   :  { %1655 = vmatpush3.bf16.msra.mxu1 %v2064_v9  ;;  %1592 = vmatprep.mubr.msk.f32.mxu1 %vm1959_vm1, %v1960_v1 }
 0x893   :  { %1656 = vmatprep.subr.bf16.mxu1 %v1958_v0 }
 0x896   :  { %1658 = vmatpush3.bf16.msra.mxu1 %v2069_v14 }
 0x897   :  { %1665 = vmatprep.subr.bf16.mxu1 %v1958_v0 }
 0x964   :  { %v746_v16 = vpop.f32.mrb[4].mxu1 }
 0x965   :  { %v751_v17 = vrot.slane %v746_v16, 1  ;;  %v754_v18 = vadd.f32 %v746_v16, %v672_v15  ;;  %v1572_v19 = vpop.f32.mrb[5].mxu1 }
 0x967   :  { %v755_v21 = vadd.f32 %v751_v17, %v673_v20  ;;  %1733 = vtanh.f32 %v754_v18  ;;  %v1455_v24 = vmul.f32 -1.442695, %v754_v18 }
 0x969   :  { %1735 = vtanh.f32 %v755_v21  ;;  %v1456_v25 = vmul.f32 -1.442695, %v755_v21 }
 0x96a   :  { %1737 = vpow2.f32 %v1455_v24 }
 0x96b   :  { %1739 = vpow2.f32 %v1456_v25 }
 0x971   :  { %v1734_v22 = vpop.eup %1733 }
 0x972   :  { %774 = vrot.lane.b32.xlu0 %v1734_v22, %s1961_s2 }
 0x973   :  { %v1736_v23 = vpop.eup %1735 }
 0x974   :  { %776 = vrot.lane.b32.xlu1 %v1736_v23, %s1961_s2  ;;  %v1738_v26 = vpop.eup %1737 }
 0x975   :  { %v1740_v27 = vpop.eup %1739  ;;  %v762_v28 = vadd.f32 1.0, %v1738_v26 }
 0x976   :  { %v763_v29 = vadd.f32 1.0, %v1740_v27 }
 0x977   :  { %1741 = vrcp.f32 %v762_v28 }
 0x978   :  { %1743 = vrcp.f32 %v763_v29 }
 0x981   :  { %v1742_v30 = vpop.eup %1741 }
 0x982   :  { %v1744_v35 = vpop.eup %1743  ;;  %v770_v38 = vmul.f32 %v1742_v30, %v648_v62 }
 0x983   :  { %v771_v41 = vmul.f32 %v1744_v35, %v649_v3 }
 0x9e4   :  { %v775_v31 = vpop.permute.xlu0 %774 }
 0x9e5   :  { %v780_v34 = vmul.f32 %v1742_v30, %v775_v31 }
 0x9e6   :  { %v777_v36 = vpop.permute.xlu1 %776 }
 0x9e7   :  { %784 = vrot.lane.b32.xlu0 %v780_v34, %s1961_s2  ;;  %v781_v37 = vmul.f32 %v1744_v35, %v777_v36 }
 0x9e9   :  { %786 = vrot.lane.b32.xlu1 %v781_v37, %s1961_s2 }
 0xa59   :  { %v785_v39 = vpop.permute.xlu0 %784 }
 0xa5a   :  { %v790_v40 = vadd.f32 %v785_v39, %v770_v38 }
 0xa5b   :  { %v787_v42 = vpop.permute.xlu1 %786 }
 0xa5c   :  { %1745 = vtanh.f32 %v790_v40  ;;  %v791_v43 = vadd.f32 %v787_v42, %v771_v41 }
 0xa5e   :  { %1747 = vtanh.f32 %v791_v43 }
 0xa66   :  { %v1746_v44 = vpop.eup %1745 }
 0xa67   :  { %796 = vrot.lane.b32.xlu0 %v1746_v44, %s1961_s2 }
 0xa68   :  { %v1748_v45 = vpop.eup %1747 }
 0xa69   :  { %798 = vrot.lane.b32.xlu1 %v1748_v45, %s1961_s2 }
 0xad9   :  { %v797_v46 = vpop.permute.xlu0 %796 }
 0xada   :  { %v2165_v49 = vmul.f32 %v1742_v30, %v797_v46 }
 0xadb   :  { %v799_v47 = vpop.permute.xlu1 %798 }
 0xadc   :  { %v2163_v48 = vmul.f32 %v1744_v35, %v799_v47  ;;  %v956_v35 = vld [vmem:[#allocation2 + $0x5] sm:$0x1] }
 0xade   :  { %v816_v50 = vrot.slane %v2163_v48, 7 }
 0xae0   :  { %v817_v51 = vsel %vm390_vm4, %v816_v50, %v2165_v49 }
 0xae1   :  { %818 = vrot.lane.b32.xlu1 %v817_v51, %s1962_s3 }
 0xb53   :  { %v819_v52 = vpop.permute.xlu1 %818 }
 0xb54   :  { %1582 = vmatmul.mubr.msk.f32.vlgmr.msra.gmra.mrb[6].mxu0 %vm240_vm3, %v819_v52 }
 0xb55   :  { %1661 = vmatpush3.bf16.msra.mxu0 %v2064_v9  ;;  %1603 = vmatprep.mubr.msk.f32.mxu0 %vm1959_vm1, %v1960_v1 }
 0xb56   :  { %1662 = vmatprep.subr.bf16.mxu0 %v1958_v0 }
 0xb59   :  { %1664 = vmatpush3.bf16.msra.mxu0 %v2069_v14 }
 0xc27   :  { %v888_v54 = vpop.f32.mrb[6].mxu0 }
 0xc28   :  { %v893_v56 = vrot.slane %v888_v54, 1  ;;  %v896_v57 = vadd.f32 %v888_v54, %v814_v53  ;;  %v1583_v59 = vpop.f32.mrb[7].mxu0 }
 0xc2a   :  { %v897_v61 = vadd.f32 %v893_v56, %v815_v60  ;;  %1749 = vtanh.f32 %v896_v57  ;;  %v1458_v2 = vmul.f32 -1.442695, %v896_v57 }
 0xc2c   :  { %1751 = vtanh.f32 %v897_v61  ;;  %v1459_v3 = vmul.f32 -1.442695, %v897_v61 }
 0xc2d   :  { %1753 = vpow2.f32 %v1458_v2 }
 0xc2e   :  { %1755 = vpow2.f32 %v1459_v3 }
 0xc34   :  { %v1750_v62 = vpop.eup %1749 }
 0xc35   :  { %916 = vrot.lane.b32.xlu1 %v1750_v62, %s1961_s2 }
 0xc36   :  { %v1752_v63 = vpop.eup %1751 }
 0xc37   :  { %918 = vrot.lane.b32.xlu0 %v1752_v63, %s1961_s2  ;;  %v1754_v4 = vpop.eup %1753 }
 0xc38   :  { %v1756_v5 = vpop.eup %1755  ;;  %v904_v6 = vadd.f32 1.0, %v1754_v4 }
 0xc39   :  { %v905_v7 = vadd.f32 1.0, %v1756_v5 }
 0xc3a   :  { %1757 = vrcp.f32 %v904_v6 }
 0xc3b   :  { %1759 = vrcp.f32 %v905_v7 }
 0xc44   :  { %v1758_v11 = vpop.eup %1757 }
 0xc45   :  { %v1760_v15 = vpop.eup %1759  ;;  %v912_v18 = vmul.f32 %v1758_v11, %v790_v40  ;;  %v957_v40 = vld [vmem:[#allocation2 + $0xd] sm:$0x1] }
 0xc46   :  { %v913_v21 = vmul.f32 %v1760_v15, %v791_v43 }
 0xca7   :  { %v917_v12 = vpop.permute.xlu1 %916 }
 0xca8   :  { %v922_v13 = vmul.f32 %v1758_v11, %v917_v12  ;;  %v1098_v12 = vld [vmem:[#allocation2 + $0x6] sm:$0x1] }
 0xca9   :  { %v919_v16 = vpop.permute.xlu0 %918 }
 0xcaa   :  { %926 = vrot.lane.b32.xlu1 %v922_v13, %s1961_s2  ;;  %v923_v17 = vmul.f32 %v1760_v15, %v919_v16 }
 0xcac   :  { %928 = vrot.lane.b32.xlu0 %v923_v17, %s1961_s2 }
 0xd1c   :  { %v927_v19 = vpop.permute.xlu1 %926 }
 0xd1d   :  { %v932_v20 = vadd.f32 %v927_v19, %v912_v18  ;;  %v1099_v18 = vld [vmem:[#allocation2 + $0xe] sm:$0x1] }
 0xd1e   :  { %v929_v22 = vpop.permute.xlu0 %928 }
 0xd1f   :  { %1761 = vtanh.f32 %v932_v20  ;;  %v933_v23 = vadd.f32 %v929_v22, %v913_v21 }
 0xd21   :  { %1763 = vtanh.f32 %v933_v23 }
 0xd29   :  { %v1762_v24 = vpop.eup %1761 }
 0xd2a   :  { %938 = vrot.lane.b32.xlu1 %v1762_v24, %s1961_s2 }
 0xd2b   :  { %v1764_v25 = vpop.eup %1763 }
 0xd2c   :  { %940 = vrot.lane.b32.xlu0 %v1764_v25, %s1961_s2 }
 0xd9c   :  { %v939_v26 = vpop.permute.xlu1 %938 }
 0xd9d   :  { %v2185_v29 = vmul.f32 %v1758_v11, %v939_v26 }
 0xd9e   :  { %v941_v27 = vpop.permute.xlu0 %940 }
 0xd9f   :  { %v2183_v28 = vmul.f32 %v1760_v15, %v941_v27 }
 0xda1   :  { %v958_v30 = vrot.slane %v2183_v28, 7 }
 0xda3   :  { %v959_v31 = vsel %vm390_vm4, %v958_v30, %v2185_v29 }
 0xda4   :  { %960 = vrot.lane.b32.xlu0 %v959_v31, %s1962_s3 }
 0xe16   :  { %v961_v34 = vpop.permute.xlu0 %960 }
 0xe17   :  { %1593 = vmatmul.mubr.msk.f32.vlgmr.msra.gmra.mrb[6].mxu1 %vm240_vm3, %v961_v34 }
 0xe18   :  { %1667 = vmatpush3.bf16.msra.mxu1 %v2064_v9  ;;  %1614 = vmatprep.mubr.msk.f32.mxu1 %vm1959_vm1, %v1960_v1 }
 0xe19   :  { %1668 = vmatprep.subr.bf16.mxu1 %v1958_v0 }
 0xe1c   :  { %1670 = vmatpush3.bf16.msra.mxu1 %v2069_v14 }
 0xeea   :  { %v1030_v36 = vpop.f32.mrb[6].mxu1 }
 0xeeb   :  { %v1035_v37 = vrot.slane %v1030_v36, 1  ;;  %v1038_v38 = vadd.f32 %v1030_v36, %v956_v35  ;;  %v1594_v39 = vpop.f32.mrb[7].mxu1 }
 0xeed   :  { %v1039_v41 = vadd.f32 %v1035_v37, %v957_v40  ;;  %1765 = vtanh.f32 %v1038_v38  ;;  %v1461_v1 = vmul.f32 -1.442695, %v1038_v38 }
 0xeef   :  { %1767 = vtanh.f32 %v1039_v41  ;;  %v1462_v43 = vmul.f32 -1.442695, %v1039_v41 }
 0xef0   :  { %1769 = vpow2.f32 %v1461_v1 }
 0xef1   :  { %1771 = vpow2.f32 %v1462_v43 }
 0xef7   :  { %v1766_v42 = vpop.eup %1765 }
 0xef8   :  { %1058 = vrot.lane.b32.xlu0 %v1766_v42, %s1961_s2 }
 0xef9   :  { %v1768_v9 = vpop.eup %1767 }
 0xefa   :  { %1060 = vrot.lane.b32.xlu1 %v1768_v9, %s1961_s2  ;;  %v1770_v0 = vpop.eup %1769 }
 0xefb   :  { %v1772_v14 = vpop.eup %1771  ;;  %v1046_v44 = vadd.f32 1.0, %v1770_v0 }
 0xefc   :  { %v1047_v45 = vadd.f32 1.0, %v1772_v14 }
 0xefd   :  { %1773 = vrcp.f32 %v1046_v44 }
 0xefe   :  { %1775 = vrcp.f32 %v1047_v45 }
 0xf07   :  { %v1774_v46 = vpop.eup %1773 }
 0xf08   :  { %v1776_v51 = vpop.eup %1775  ;;  %v1054_v54 = vmul.f32 %v1774_v46, %v932_v20 }
 0xf09   :  { %v1055_v59 = vmul.f32 %v1776_v51, %v933_v23 }
 0xf6a   :  { %v1059_v47 = vpop.permute.xlu0 %1058 }
 0xf6b   :  { %v1064_v50 = vmul.f32 %v1774_v46, %v1059_v47 }
 0xf6c   :  { %v1061_v52 = vpop.permute.xlu1 %1060 }
 0xf6d   :  { %1068 = vrot.lane.b32.xlu0 %v1064_v50, %s1961_s2  ;;  %v1065_v53 = vmul.f32 %v1776_v51, %v1061_v52 }
 0xf6f   :  { %1070 = vrot.lane.b32.xlu1 %v1065_v53, %s1961_s2 }
 0xfdf   :  { %v1069_v56 = vpop.permute.xlu0 %1068 }
 0xfe0   :  { %v1074_v57 = vadd.f32 %v1069_v56, %v1054_v54 }
 0xfe1   :  { %v1071_v60 = vpop.permute.xlu1 %1070 }
 0xfe2   :  { %1777 = vtanh.f32 %v1074_v57  ;;  %v1075_v61 = vadd.f32 %v1071_v60, %v1055_v59 }
 0xfe4   :  { %1779 = vtanh.f32 %v1075_v61 }
 0xfec   :  { %v1778_v62 = vpop.eup %1777 }
 0xfed   :  { %1080 = vrot.lane.b32.xlu0 %v1778_v62, %s1961_s2 }
 0xfee   :  { %v1780_v63 = vpop.eup %1779 }
 0xfef   :  { %1082 = vrot.lane.b32.xlu1 %v1780_v63, %s1961_s2 }
0x105f   :  { %v1081_v2 = vpop.permute.xlu0 %1080 }
0x1060   :  { %v2205_v5 = vmul.f32 %v1774_v46, %v1081_v2 }
0x1061   :  { %v1083_v3 = vpop.permute.xlu1 %1082 }
0x1062   :  { %v2203_v4 = vmul.f32 %v1776_v51, %v1083_v3  ;;  %v1240_v51 = vld [vmem:[#allocation2 + $0x7] sm:$0x1] }
0x1064   :  { %v1100_v6 = vrot.slane %v2203_v4, 7 }
0x1066   :  { %v1101_v7 = vsel %vm390_vm4, %v1100_v6, %v2205_v5 }
0x1067   :  { %1102 = vrot.lane.b32.xlu1 %v1101_v7, %s1962_s3 }
0x10d9   :  { %v1103_v11 = vpop.permute.xlu1 %1102 }
0x10da   :  { %1604 = vmatmul.mubr.msk.f32.vlgmr.msra.gmra.mrb[8].mxu0 %vm240_vm3, %v1103_v11 }
0x11ad   :  { %v1172_v13 = vpop.f32.mrb[8].mxu0 }
0x11ae   :  { %v1177_v15 = vrot.slane %v1172_v13, 1  ;;  %v1180_v16 = vadd.f32 %v1172_v13, %v1098_v12  ;;  %v1605_v17 = vpop.f32.mrb[9].mxu0 }
0x11b0   :  { %v1181_v19 = vadd.f32 %v1177_v15, %v1099_v18  ;;  %1781 = vtanh.f32 %v1180_v16  ;;  %v1464_v22 = vmul.f32 -1.442695, %v1180_v16 }
0x11b2   :  { %1783 = vtanh.f32 %v1181_v19  ;;  %v1465_v23 = vmul.f32 -1.442695, %v1181_v19 }
0x11b3   :  { %1785 = vpow2.f32 %v1464_v22 }
0x11b4   :  { %1787 = vpow2.f32 %v1465_v23 }
0x11ba   :  { %v1782_v20 = vpop.eup %1781 }
0x11bb   :  { %1200 = vrot.lane.b32.xlu1 %v1782_v20, %s1961_s2 }
0x11bc   :  { %v1784_v21 = vpop.eup %1783 }
0x11bd   :  { %1202 = vrot.lane.b32.xlu0 %v1784_v21, %s1961_s2  ;;  %v1786_v24 = vpop.eup %1785 }
0x11be   :  { %v1788_v25 = vpop.eup %1787  ;;  %v1188_v26 = vadd.f32 1.0, %v1786_v24 }
0x11bf   :  { %v1189_v27 = vadd.f32 1.0, %v1788_v25 }
0x11c0   :  { %1789 = vrcp.f32 %v1188_v26 }
0x11c1   :  { %1791 = vrcp.f32 %v1189_v27 }
0x11ca   :  { %v1790_v30 = vpop.eup %1789 }
0x11cb   :  { %v1792_v35 = vpop.eup %1791  ;;  %v1196_v38 = vmul.f32 %v1790_v30, %v1074_v57  ;;  %v1241_v57 = vld [vmem:[#allocation2 + $0xf] sm:$0x1] }
0x11cc   :  { %v1197_v41 = vmul.f32 %v1792_v35, %v1075_v61 }
0x122d   :  { %v1201_v31 = vpop.permute.xlu1 %1200 }
0x122e   :  { %v1206_v34 = vmul.f32 %v1790_v30, %v1201_v31 }
0x122f   :  { %v1203_v36 = vpop.permute.xlu0 %1202 }
0x1230   :  { %1210 = vrot.lane.b32.xlu1 %v1206_v34, %s1961_s2  ;;  %v1207_v37 = vmul.f32 %v1792_v35, %v1203_v36 }
0x1232   :  { %1212 = vrot.lane.b32.xlu0 %v1207_v37, %s1961_s2 }
0x12a2   :  { %v1211_v39 = vpop.permute.xlu1 %1210 }
0x12a3   :  { %v1216_v40 = vadd.f32 %v1211_v39, %v1196_v38 }
0x12a4   :  { %v1213_v42 = vpop.permute.xlu0 %1212 }
0x12a5   :  { %1793 = vtanh.f32 %v1216_v40  ;;  %v1217_v9 = vadd.f32 %v1213_v42, %v1197_v41 }
0x12a7   :  { %1795 = vtanh.f32 %v1217_v9 }
0x12af   :  { %v1794_v1 = vpop.eup %1793 }
0x12b0   :  { %1222 = vrot.lane.b32.xlu1 %v1794_v1, %s1961_s2 }
0x12b1   :  { %v1796_v43 = vpop.eup %1795 }
0x12b2   :  { %1224 = vrot.lane.b32.xlu0 %v1796_v43, %s1961_s2 }
0x1322   :  { %v1223_v0 = vpop.permute.xlu1 %1222 }
0x1323   :  { %v1228_v45 = vmul.f32 %v1790_v30, %v1223_v0 }
0x1324   :  { %v1225_v14 = vpop.permute.xlu0 %1224 }
0x1325   :  { %v2218_v44 = vmul.f32 %v1792_v35, %v1225_v14 }
0x1327   :  { %v1242_v46 = vrot.slane %v2218_v44, 7 }
0x1329   :  { %v1243_v47 = vsel %vm390_vm4, %v1242_v46, %v1228_v45 }
0x132a   :  { %1244 = vrot.lane.b32.xlu0 %v1243_v47, %s1962_s3 }
0x139c   :  { %v1245_v50 = vpop.permute.xlu0 %1244 }
0x139d   :  { %1615 = vmatmul.mubr.msk.f32.vlgmr.msra.gmra.mrb[8].mxu1 %vm240_vm3, %v1245_v50 }
0x1470   :  { %v1314_v52 = vpop.f32.mrb[8].mxu1 }
0x1471   :  { %v1319_v53 = vrot.slane %v1314_v52, 1  ;;  %v1322_v54 = vadd.f32 %v1314_v52, %v1240_v51  ;;  %v1616_v56 = vpop.f32.mrb[9].mxu1 }
0x1473   :  { %v1323_v59 = vadd.f32 %v1319_v53, %v1241_v57  ;;  %1797 = vtanh.f32 %v1322_v54  ;;  %v1467_v62 = vmul.f32 -1.442695, %v1322_v54 }
0x1475   :  { %1799 = vtanh.f32 %v1323_v59  ;;  %v1468_v63 = vmul.f32 -1.442695, %v1323_v59 }
0x1476   :  { %1801 = vpow2.f32 %v1467_v62 }
0x1477   :  { %1803 = vpow2.f32 %v1468_v63 }
0x147d   :  { %v1798_v60 = vpop.eup %1797 }
0x147e   :  { %1342 = vrot.lane.b32.xlu0 %v1798_v60, %s1961_s2 }
0x147f   :  { %v1800_v61 = vpop.eup %1799 }
0x1480   :  { %1344 = vrot.lane.b32.xlu1 %v1800_v61, %s1961_s2  ;;  %v1802_v2 = vpop.eup %1801 }
0x1481   :  { %v1804_v3 = vpop.eup %1803  ;;  %v1330_v6 = vadd.f32 1.0, %v1802_v2 }
0x1482   :  { %v1331_v7 = vadd.f32 1.0, %v1804_v3 }
0x1483   :  { %1805 = vrcp.f32 %v1330_v6 }
0x1484   :  { %1807 = vrcp.f32 %v1331_v7 }
0x148d   :  { %v1806_v11 = vpop.eup %1805 }
0x148e   :  { %v1808_v15 = vpop.eup %1807  ;;  %v1338_v18 = vmul.f32 %v1806_v11, %v1216_v40 }
0x148f   :  { %v1339_v21 = vmul.f32 %v1808_v15, %v1217_v9 }
0x14f0   :  { %v1343_v12 = vpop.permute.xlu0 %1342 }
0x14f1   :  { %v1348_v13 = vmul.f32 %v1806_v11, %v1343_v12 }
0x14f2   :  { %v1345_v16 = vpop.permute.xlu1 %1344 }
0x14f3   :  { %1352 = vrot.lane.b32.xlu0 %v1348_v13, %s1961_s2  ;;  %v1349_v17 = vmul.f32 %v1808_v15, %v1345_v16 }
0x14f5   :  { %1354 = vrot.lane.b32.xlu1 %v1349_v17, %s1961_s2 }
0x1565   :  { %v1353_v19 = vpop.permute.xlu0 %1352 }
0x1566   :  { %v1358_v20 = vadd.f32 %v1353_v19, %v1338_v18 }
0x1567   :  { %v1355_v22 = vpop.permute.xlu1 %1354 }
0x1568   :  { %1809 = vtanh.f32 %v1358_v20  ;;  %v1359_v23 = vadd.f32 %v1355_v22, %v1339_v21 }
0x156a   :  { %1811 = vtanh.f32 %v1359_v23  ;;  %v1391_v24 = vrot.slane %v1359_v23, 7 }
0x156c   :  { %v1392_v25 = vsel %vm390_vm4, %v1391_v24, %v1358_v20 }
0x1572   :  { %v1810_v26 = vpop.eup %1809 }
0x1573   :  { %1364 = vrot.lane.b32.xlu0 %v1810_v26, %s1961_s2 }
0x1574   :  { %v1812_v27 = vpop.eup %1811 }
0x1575   :  { %1366 = vrot.lane.b32.xlu1 %v1812_v27, %s1961_s2 }
0x1577   :  { %378 = vrot.lane.b32.xlu0 %v2103_v58, %s1962_s3 }
0x1579   :  { %380 = vrot.lane.b32.xlu1 %v2100_v55, %s1962_s3 }
0x157b   :  { %522 = vrot.lane.b32.xlu0 %v2123_v33, %s1962_s3 }
0x157d   :  { %524 = vrot.lane.b32.xlu1 %v2121_v32, %s1962_s3 }
0x157f   :  { %664 = vrot.lane.b32.xlu0 %v2144_v10, %s1962_s3 }
0x1581   :  { %666 = vrot.lane.b32.xlu1 %v2142_v8, %s1962_s3 }
0x1583   :  { %806 = vrot.lane.b32.xlu0 %v2165_v49, %s1962_s3 }
0x1585   :  { %808 = vrot.lane.b32.xlu1 %v2163_v48, %s1962_s3 }
0x1587   :  { %948 = vrot.lane.b32.xlu0 %v2185_v29, %s1962_s3 }
0x1589   :  { %950 = vrot.lane.b32.xlu1 %v2183_v28, %s1962_s3 }
0x158b   :  { %1090 = vrot.lane.b32.xlu0 %v2205_v5, %s1962_s3 }
0x158d   :  { %1092 = vrot.lane.b32.xlu1 %v2203_v4, %s1962_s3 }
0x158f   :  { %1232 = vrot.lane.b32.xlu0 %v1228_v45, %s1962_s3 }
0x1591   :  { %1234 = vrot.lane.b32.xlu1 %v2218_v44, %s1962_s3 }
0x15e5   :  { %v1365_v55 = vpop.permute.xlu0 %1364 }
0x15e6   :  { %v1370_v58 = vmul.f32 %v1806_v11, %v1365_v55 }
0x15e7   :  { %v1367_v32 = vpop.permute.xlu1 %1366 }
0x15e8   :  { %1374 = vrot.lane.b32.xlu0 %v1370_v58, %s1962_s3  ;;  %v1371_v33 = vmul.f32 %v1808_v15, %v1367_v32 }
0x15e9   :  { %v379_v8 = vpop.permute.xlu0 %378 }
0x15ea   :  { %385 = vst.msk [vmem:[#allocation9] sm:$0x1] %vm384_vm5, %v379_v8  ;;  %v1382_v10 = vrot.slane %v1371_v33, 7 }
0x15eb   :  { %v381_v48 = vpop.permute.xlu1 %380 }
0x15ec   :  { %1393 = vrot.lane.b32.xlu0 %v1392_v25, %s1963_s13  ;;  %386 = vst.msk [vmem:[#allocation9 + $0x8] sm:$0x1] %vm384_vm5, %v381_v48  ;;  %v1383_v28 = vsel %vm390_vm4, %v1382_v10, %v1370_v58 }
0x15ed   :  { %v523_v49 = vpop.permute.xlu0 %522  ;;  %1384 = vrot.lane.b32.xlu1 %v1383_v28, %s1962_s3 }
0x15ee   :  { %528 = vst.msk [vmem:[#allocation9 + $0x1] sm:$0x1] %vm384_vm5, %v523_v49 }
0x15ef   :  { %v525_v29 = vpop.permute.xlu1 %524 }
0x15f0   :  { %529 = vst.msk [vmem:[#allocation9 + $0x9] sm:$0x1] %vm384_vm5, %v525_v29 }
0x15f1   :  { %v665_v4 = vpop.permute.xlu0 %664  ;;  %1376 = vrot.lane.b32.xlu1 %v1371_v33, %s1962_s3 }
0x15f2   :  { %670 = vst.msk [vmem:[#allocation9 + $0x2] sm:$0x1] %vm384_vm5, %v665_v4 }
0x15f3   :  { %v667_v5 = vpop.permute.xlu1 %666 }
0x15f4   :  { %671 = vst.msk [vmem:[#allocation9 + $0xa] sm:$0x1] %vm384_vm5, %v667_v5 }
0x15f5   :  { %v807_v30 = vpop.permute.xlu0 %806 }
0x15f6   :  { %812 = vst.msk [vmem:[#allocation9 + $0x3] sm:$0x1] %vm384_vm5, %v807_v30 }
0x15f7   :  { %v809_v31 = vpop.permute.xlu1 %808 }
0x15f8   :  { %813 = vst.msk [vmem:[#allocation9 + $0xb] sm:$0x1] %vm384_vm5, %v809_v31 }
0x15f9   :  { %v949_v34 = vpop.permute.xlu0 %948 }
0x15fa   :  { %954 = vst.msk [vmem:[#allocation9 + $0x4] sm:$0x1] %vm384_vm5, %v949_v34 }
0x15fb   :  { %v951_v35 = vpop.permute.xlu1 %950 }
0x15fc   :  { %955 = vst.msk [vmem:[#allocation9 + $0xc] sm:$0x1] %vm384_vm5, %v951_v35 }
0x15fd   :  { %v1091_v36 = vpop.permute.xlu0 %1090 }
0x15fe   :  { %1096 = vst.msk [vmem:[#allocation9 + $0x5] sm:$0x1] %vm384_vm5, %v1091_v36 }
0x15ff   :  { %v1093_v37 = vpop.permute.xlu1 %1092 }
0x1600   :  { %1097 = vst.msk [vmem:[#allocation9 + $0xd] sm:$0x1] %vm384_vm5, %v1093_v37 }
0x1601   :  { %v1233_v38 = vpop.permute.xlu0 %1232 }
0x1602   :  { %1238 = vst.msk [vmem:[#allocation9 + $0x6] sm:$0x1] %vm384_vm5, %v1233_v38 }
0x1603   :  { %v1235_v39 = vpop.permute.xlu1 %1234 }
0x1604   :  { %1239 = vst.msk [vmem:[#allocation9 + $0xe] sm:$0x1] %vm384_vm5, %v1235_v39 }
0x165a   :  { %v1375_v40 = vpop.permute.xlu0 %1374 }
0x165b   :  { %1380 = vst.msk [vmem:[#allocation9 + $0x7] sm:$0x1] %vm384_vm5, %v1375_v40 }
0x165e   :  { %v1394_v41 = vpop.permute.xlu0 %1393 }
0x165f   :  { %1396 = vst.msk [vmem:[#allocation12] sm:$0x3] %vm67_vm0, %v1394_v41  ;;  %v1385_v42 = vpop.permute.xlu1 %1384 }
0x1660   :  { %1388 = vst.msk [vmem:[#allocation10] sm:$0x3] %vm67_vm0, %v1385_v42 }
0x1661   :  { %1890 = shalt.err (!%p1887_p0)
}
0x1662   :  { %s1891_s22 = scalar_lea.hbm %s2331_s5, 32 }
0x1663   :  { %p1892_p1 = scmp.ne.s32.totalorder %s2331_s5, %s1891_s22  ;;  %p1895_p2 = scmp.lt.u32.totalorder %s1891_s22, %s2331_s5 }
0x1665   :  { %p1897_p3 = pnand %p1895_p2, %p1892_p1 }
0x1667   :  { %1900 = shalt.err (!%p1897_p3)
}
0x1668   :  { %1418 = dma.vmem_to_hbm [thread:$0]  %s1416_s15, 32, %s2331_s5, [#allocation11]  }
0x1669   :  { %s1901_s30 = scalar_lea.vmem %s1426_s17, 32  ;;  %p1906_p5 = scmp.lt.s32.totalorder %s1426_s17, %s1426_s17 }
0x166a   :  { %p1902_p4 = scmp.ne.s32.totalorder %s1426_s17, %s1901_s30  ;;  %p1907_p6 = scmp.lt.s32.totalorder %s1901_s30, %s1901_s30 }
0x166c   :  { %p1908_p7 = por %p1907_p6, %p1906_p5 }
0x166e   :  { %p1909_p8 = pnand %p1908_p7, %p1902_p4 }
0x1670   :  { %1912 = shalt.err (!%p1909_p8)
}
0x1671   :  { %s1913_s0 = scalar_lea.hbm %s2332_s6, 32 }
0x1672   :  { %p1914_p9 = scmp.ne.s32.totalorder %s2332_s6, %s1913_s0  ;;  %p1917_p10 = scmp.lt.u32.totalorder %s1913_s0, %s2332_s6 }
0x1674   :  { %p1919_p11 = pnand %p1917_p10, %p1914_p9 }
0x1676   :  { %1922 = shalt.err (!%p1919_p11)
}
0x1677   :  { %1428 = dma.vmem_to_hbm [thread:$0]  %s1426_s17, 32, %s2332_s6, [#allocation11]   ;;  %v1377_v9 = vpop.permute.xlu1 %1376 }
0x1678   :  { %1381 = vst.msk [vmem:[#allocation9 + $0xf] sm:$0x1] %vm384_vm5, %v1377_v9  ;;  %s1923_s13 = scalar_lea.vmem %s2279_s19, 256  ;;  %p1928_p13 = scmp.lt.s32.totalorder %s2279_s19, %s2279_s19 }
0x1679   :  { %p1924_p12 = scmp.ne.s32.totalorder %s2279_s19, %s1923_s13  ;;  %p1929_p0 = scmp.lt.s32.totalorder %s1923_s13, %s1923_s13 }
0x167b   :  { %p1930_p1 = por %p1929_p0, %p1928_p13 }
0x167d   :  { %p1931_p2 = pnand %p1930_p1, %p1924_p12 }
0x167f   :  { %1934 = shalt.err (!%p1931_p2)
}
0x1680   :  { %s1935_s16 = scalar_lea.hbm %s2330_s4, 256 }
0x1681   :  { %p1936_p3 = scmp.ne.s32.totalorder %s2330_s4, %s1935_s16  ;;  %p1939_p4 = scmp.lt.u32.totalorder %s1935_s16, %s2330_s4 }
0x1683   :  { %p1941_p5 = pnand %p1939_p4, %p1936_p3 }
0x1685   :  { %1944 = shalt.err (!%p1941_p5)
}
0x1686   :  { %1408 = dma.vmem_to_hbm [thread:$0]  %s2279_s19, 256, %s2330_s4, [#allocation5], %s1955_s9, %s1955_s9, %s1956_s10  }
0x1687   :  { %1949 = dma.done.wait [#allocation5], 256  }
0x1688   :  { %1950 = vsyncadd [#allocation5], 4294967040 }
0x1689   :  { %1951 = dma.done.wait [#allocation11], 64  }
0x168a   :  { %1952 = vsyncadd [#allocation11], 4294967232 }
0x168b   :  { %1438 = vsyncpa [#allocation4], 1 }
0x168c   :  { %1439 = vsyncpa [#allocation7], 1 }
0x168d   :  { %1440 = vsyncpa [#allocation5], 1 }
0x168e   :  { %1441 = vsyncpa [#allocation11], 1 }

</bundles_post_ra>
